<compile_context>
chip_gen: v6e
topology: v6e:2x2x1
jax: 0.10.0
libtpu: 0.0.40
codegen_flags: <defaults>
</compile_context>

<pallas_src>
import jax
import jax.numpy as jnp
from jax import lax
from jax.experimental import pallas as pl
from jax.experimental.pallas import tpu as pltpu


_C_PAD = 8          # padded class dimension (3 real classes) -- small f32 writeback
_NEG = -1e30        # mask value / padded-class bias


def _round_up(x, m):
    return (x + m - 1) // m * m


# -----------------------------------------------------------------------------
# Pallas kernel: full SNILayer forward for one batch tile per grid step.
# -----------------------------------------------------------------------------
def _sni_layer_kernel(x_ref,      # (S, BT, H)      bf16 memory_bank slab
                      len_ref,    # (1, BT)         int32 lengths (lane-dense)
                      w_att_ref,  # (1, H)          f32  attention score vector
                      w_sni_ref,  # (H, H)          bf16 linear_sni weight (in, out)
                      b_sni_ref,  # (1, H)          f32  linear_sni bias
                      w_out_ref,  # (H, C_PAD)      bf16 linear_out weight (pad cols 0)
                      b_out_ref,  # (1, C_PAD)      f32  linear_out bias (-1e30 pad cols)
                      out_ref):   # (S, BT, C_PAD)  f32  log-probs
    xb = x_ref[...]                                      # (S, BT, H) bf16
    S, BT, H = xb.shape
    xf = xb.astype(jnp.float32)                          # f32 for softmax / gate math

    # ---- SelfAttention scores: VPU multiply + XLU lane reduce -> lane-dense (S, BT)
    w_att = w_att_ref[...].reshape(1, 1, H)
    scores = jnp.sum(xf * w_att, axis=-1)                # (S, BT)

    # length mask over the sequence axis (BT mapped to lanes)
    lens = len_ref[...]                                  # (1, BT) int32
    pos = lax.broadcasted_iota(jnp.int32, (S, BT), 0)    # (S, BT)
    valid = pos < lens                                   # (S, BT)

    neg = jnp.float32(_NEG)
    scores = jnp.where(valid, scores, neg)
    m = jnp.max(scores, axis=0, keepdims=True)           # (1, BT)
    e = jnp.where(valid, jnp.exp(scores - m), 0.0)       # (S, BT)
    denom = jnp.sum(e, axis=0, keepdims=True)            # (1, BT)
    # exact division (denom is only (1, BT)); guard length==0 padded batch rows
    alpha = e / jnp.maximum(denom, jnp.float32(1e-30))   # (S, BT)

    glob = jnp.sum(alpha[:, :, None] * xf, axis=0, keepdims=True)   # (1, BT, H)

    # ---- gate (f32 VPU), flatten to fill the MXU M dimension ----
    states = (xf * glob).reshape(S * BT, H).astype(jnp.bfloat16)

    # ---- linear_sni + relu (bf16 MXU, f32 accumulate) ----
    h = jnp.dot(states, w_sni_ref[...],
                preferred_element_type=jnp.float32) + b_sni_ref[...]   # (S*BT, H)
    h = jnp.maximum(h, 0.0)

    # ---- linear_out (8-wide padded classes) + log-softmax ----
    logits = jnp.dot(h.astype(jnp.bfloat16), w_out_ref[...],
                     preferred_element_type=jnp.float32) + b_out_ref[...]  # (S*BT, 8)
    lmax = jnp.max(logits, axis=-1, keepdims=True)
    shifted = logits - lmax
    lse = jnp.log(jnp.sum(jnp.exp(shifted), axis=-1, keepdims=True))
    out_ref[...] = (shifted - lse).reshape(S, BT, _C_PAD).astype(out_ref.dtype)


# -----------------------------------------------------------------------------
# Generation-aware tiling / VMEM sizing helpers.
# -----------------------------------------------------------------------------
def _vmem_capacity_bytes():
    """Per-TensorCore VMEM capacity; conservative v7x default if the query fails."""
    try:
        cap = int(pltpu.get_tpu_info().vmem_capacity_bytes)
        if cap > 0:
            return cap
    except Exception:
        pass
    return 64 << 20


def _per_batch_vmem_bytes(S, H):
    """Approx VMEM bytes one batch element costs (double-buffered DMA slabs plus
    in-kernel f32/bf16 intermediates)."""
    io = 2 * (S * H * 2) + 2 * (S * _C_PAD * 4) + 2 * 4
    interm = S * (4 * H            # f32 upcast of the input slab
                  + 4 * H          # gated states (f32)
                  + 2 * H          # bf16 matmul operand
                  + 4 * H          # hidden activations (f32)
                  + 3 * 4 * _C_PAD  # logits / shifted / exp
                  + 8 * 4)         # scores / mask / exp / alpha temps
    return io + interm


def _weight_vmem_bytes(H):
    return 2 * ((H * H + H * _C_PAD) * 2 + (3 * H + _C_PAD) * 4)


def _choose_b_tile(B, per_b, fixed, vmem_cap):
    """Batch tile + padded batch.  Small batches: one full-extent tile (multiple
    of 8).  Large batches: multiple-of-128 tiles sized for VMEM, aiming for >=2
    grid steps so v7x's two TensorCores both get work."""
    b8 = _round_up(max(B, 1), 8)
    budget = int(0.55 * vmem_cap)                      # headroom for compiler temps
    bt_fit = max(8, (budget - fixed) // max(per_b, 1))
    if b8 <= max(128, min(bt_fit, 192)):
        return b8, b8                                  # single grid step
    bt = min((bt_fit // 128) * 128, max(128, (b8 // 2) // 128 * 128))
    bt = max(128, bt)
    return bt, _round_up(b8, bt)


# -----------------------------------------------------------------------------
def sni_layer_pallas(memory_bank, lengths, params):
    """memory_bank: (S, B, H) f32, lengths: (B,) int -> (S*B, 3) f32 log-probs."""
    S, B, H = memory_bank.shape
    cap = _vmem_capacity_bytes()
    per_b = _per_batch_vmem_bytes(S, H)
    fixed = _weight_vmem_bytes(H)
    b_tile, b_pad = _choose_b_tile(B, per_b, fixed, cap)

    # bf16 input stream (halves the dominant HBM read); native (S, B, H) layout.
    x = memory_bank.astype(jnp.bfloat16)
    lens = lengths.astype(jnp.int32).reshape(1, B)            # lane-dense lengths row
    if b_pad != B:
        x = jnp.pad(x, ((0, 0), (0, b_pad - B), (0, 0)))
        lens = jnp.pad(lens, ((0, 0), (0, b_pad - B)))        # padded rows: length 0

    # Weights: bf16 matmul operands, f32 biases; 3 classes padded to 8.
    w_att = params["w_att"].reshape(1, H).astype(jnp.float32)
    w_sni = params["w_sni"].astype(jnp.bfloat16)
    b_sni = params["b_sni"].astype(jnp.float32)
    w_out = jnp.pad(params["w_out"], ((0, 0), (0, _C_PAD - 3))).astype(jnp.bfloat16)
    b_out = jnp.pad(params["b_out"], ((0, 0), (0, _C_PAD - 3)),
                    constant_values=_NEG).astype(jnp.float32)

    # Intermediate-inclusive VMEM limit, capped at 0.75 * physical capacity.
    need = fixed + b_tile * per_b
    vmem_limit = int(min(0.75 * cap, max(1.25 * need, 32 << 20)))

    cost = pl.CostEstimate(
        flops=int(2 * S * b_pad * H * (H + _C_PAD) + 12 * S * b_pad * H),
        transcendentals=int(S * b_pad * (2 + _C_PAD)),
        bytes_accessed=int(S * b_pad * H * 2 + S * b_pad * _C_PAD * 4 + b_pad * 4
                           + (H * H + H * _C_PAD) * 2 + (3 * H + _C_PAD) * 4))

    def build(single_buffer_weights):
        # Constant weights never change block index -> single-buffer them to save
        # VMEM (matters under v7x's 64 MiB budget at production H).
        wkw = {"pipeline_mode": pl.Buffered(1)} if single_buffer_weights else {}
        in_specs = [
            pl.BlockSpec((S, b_tile, H), lambda b: (0, b, 0)),       # memory_bank (bf16)
            pl.BlockSpec((1, b_tile),    lambda b: (0, b)),          # lengths row
            pl.BlockSpec((1, H),         lambda b: (0, 0), **wkw),   # w_att
            pl.BlockSpec((H, H),         lambda b: (0, 0), **wkw),   # w_sni (bf16)
            pl.BlockSpec((1, H),         lambda b: (0, 0), **wkw),   # b_sni
            pl.BlockSpec((H, _C_PAD),    lambda b: (0, 0), **wkw),   # w_out (bf16, padded)
            pl.BlockSpec((1, _C_PAD),    lambda b: (0, 0), **wkw),   # b_out (padded)
        ]
        grid_spec = pltpu.PrefetchScalarGridSpec(
            num_scalar_prefetch=0,
            grid=(b_pad // b_tile,),
            in_specs=in_specs,
            out_specs=pl.BlockSpec((S, b_tile, _C_PAD), lambda b: (0, b, 0)),
        )
        return pl.pallas_call(
            _sni_layer_kernel,
            out_shape=jax.ShapeDtypeStruct((S, b_pad, _C_PAD), jnp.float32),
            grid_spec=grid_spec,
            cost_estimate=cost,
            compiler_params=pltpu.CompilerParams(
                dimension_semantics=("parallel",),     # independent batch tiles
                vmem_limit_bytes=vmem_limit),
        )

    args = (x, lens, w_att, w_sni, b_sni, w_out, b_out)
    try:
        out = build(True)(*args)
    except Exception:
        # pipeline_mode=pl.Buffered may be unsupported in this jax build; retry
        # with default (double-buffered) weight specs -- identical semantics.
        out = build(False)(*args)

    # match torch: (S, B, H).view(-1, H) row ordering; drop batch + class padding.
    return out[:, :B, :3].reshape(S * B, 3)


# -----------------------------------------------------------------------------
# Pure-JAX reference for the SNI layer (correctness check only).
# -----------------------------------------------------------------------------
def sni_layer_ref(memory_bank, lengths, params):
    S, B, H = memory_bank.shape
    scores = jnp.einsum("sbh,ho->sbo", memory_bank, params["w_att"])[..., 0]  # (S,B)
    pos = jnp.arange(S)[:, None]
    valid = pos < lengths[None, :]
    scores = jnp.where(valid, scores, -1e30)
    alpha = jax.nn.softmax(scores, axis=0)
    alpha = jnp.where(valid, alpha, 0.0)
    glob = jnp.einsum("sb,sbh->bh", alpha, memory_bank)                       # (B,H)
    states = memory_bank * glob[None]
    states = jax.nn.relu(jnp.einsum("sbh,hk->sbk", states, params["w_sni"])
                         + params["b_sni"][0])
    logits = jnp.einsum("sbh,hk->sbk", states, params["w_out"]) + params["b_out"][0]
    return jax.nn.log_softmax(logits, axis=-1).reshape(S * B, 3)


# -----------------------------------------------------------------------------
# SNIModel forward (training path): synthetic encoder/decoder glue + Pallas SNI.
# -----------------------------------------------------------------------------
def sni_model_forward(params, src, tgt, lengths, training=True):
    # TODO(synk): encoder / decoder are externally-injected, unspecified modules
    #             in the original code; synthetic linear stand-ins used here.
    memory_bank = jnp.tanh(jnp.einsum("sbf,fh->sbh", src, params["enc_w"]))   # (S,B,H)
    enc_state = memory_bank[-1]                                                # unused glue

    tgt_in = tgt[:-1]                                                          # tgt[:-1]
    copy_mask = src[:, :, 2] if src.shape[-1] > 2 else None                    # noqa: F841

    dec_out = jnp.tanh(jnp.einsum("tbf,fh->tbh", tgt_in, params["dec_w"]))     # (T-1,B,H)
    attns = jax.nn.softmax(
        jnp.einsum("tbh,sbh->tbs", dec_out, memory_bank), axis=-1)             # (T-1,B,S)

    if training:
        sni_out = sni_layer_pallas(memory_bank, lengths, params)               # (S*B, 3)
        return dec_out, attns, sni_out, memory_bank
    return dec_out, attns, None, memory_bank


# -----------------------------------------------------------------------------
def init_params(key, feat_dim, hidden):
    # NOTE: if the model config is tunable, prefer hidden as a multiple of 128
    # (ideally 256) to fill the MXU K dimension at production sizes.
    ks = jax.random.split(key, 7)
    sc = 1.0 / jnp.sqrt(hidden)
    return {
        "enc_w": jax.random.normal(ks[0], (feat_dim, hidden), jnp.float32) * 0.1,
        "dec_w": jax.random.normal(ks[1], (feat_dim, hidden), jnp.float32) * 0.1,
        # SelfAttention score vector (Linear(H, 1), bias omitted — cancels in softmax)
        "w_att": jax.random.normal(ks[2], (hidden, 1), jnp.float32) * sc,
        # torch nn.Linear stores (out, in); we keep the pre-transposed (in, out) layout.
        "w_sni": jax.random.normal(ks[3], (hidden, hidden), jnp.float32) * sc,
        "b_sni": jax.random.normal(ks[4], (1, hidden), jnp.float32) * sc,
        "w_out": jax.random.normal(ks[5], (hidden, 3), jnp.float32) * sc,
        "b_out": jax.random.normal(ks[6], (1, 3), jnp.float32) * sc,
    }


if __name__ == "__main__":
    key = jax.random.PRNGKey(0)
    S, T, B, F, H = 8, 6, 2, 3, 32

    k_src, k_tgt, k_par = jax.random.split(key, 3)
    src = jax.random.normal(k_src, (S, B, F), jnp.float32)      # (src_len, batch, feat)
    tgt = jax.random.normal(k_tgt, (T, B, F), jnp.float32)      # (tgt_len, batch, feat)
    lengths = jnp.array([8, 6], dtype=jnp.int32)                # (batch,)

    params = init_params(k_par, F, H)

    dec_out, attns, sni_out, memory_bank = sni_model_forward(
        params, src, tgt, lengths, training=True)
    jax.block_until_ready(sni_out)

    # quiet correctness check of the Pallas SNI layer vs. pure-JAX f32 reference
    # (kernel streams bf16 inputs + bf16 MXU operands -> modest tolerance)
    ref = sni_layer_ref(memory_bank, lengths, params)
    assert sni_out.shape == (S * B, 3)
    assert float(jnp.max(jnp.abs(sni_out - ref))) < 5e-2

    print("KERNEL_OK")
</pallas_src>

<mosaic_0001>
module attributes {stable_mosaic.version = 11 : i64} {
  func.func @_sni_layer_kernel(%arg0: i32, %arg1: memref<8x8x32xbf16, #tpu.memory_space<vmem>>, %arg2: memref<1x8xi32, #tpu.memory_space<vmem>>, %arg3: memref<1x32xf32, #tpu.memory_space<vmem>>, %arg4: memref<32x32xbf16, #tpu.memory_space<vmem>>, %arg5: memref<1x32xf32, #tpu.memory_space<vmem>>, %arg6: memref<32x8xbf16, #tpu.memory_space<vmem>>, %arg7: memref<1x8xf32, #tpu.memory_space<vmem>>, %arg8: memref<8x8x8xf32, #tpu.memory_space<vmem>>) attributes {dimension_semantics = [#tpu.dimension_semantics<parallel>], iteration_bounds = array<i64: 1>, scalar_prefetch = 0 : i64, scratch_operands = 0 : i64, tpu.core_type = #tpu.core_type<tc>, window_params = [{transform_indices = @transform_0, window_bounds = array<i64: 8, 8, 32>}, {transform_indices = @transform_1, window_bounds = array<i64: 1, 8>}, {pipeline_mode = #tpu.pipeline_mode<synchronous>, transform_indices = @transform_2, window_bounds = array<i64: 1, 32>}, {pipeline_mode = #tpu.pipeline_mode<synchronous>, transform_indices = @transform_3, window_bounds = array<i64: 32, 32>}, {pipeline_mode = #tpu.pipeline_mode<synchronous>, transform_indices = @transform_4, window_bounds = array<i64: 1, 32>}, {pipeline_mode = #tpu.pipeline_mode<synchronous>, transform_indices = @transform_5, window_bounds = array<i64: 32, 8>}, {pipeline_mode = #tpu.pipeline_mode<synchronous>, transform_indices = @transform_6, window_bounds = array<i64: 1, 8>}, {transform_indices = @transform_7, window_bounds = array<i64: 8, 8, 8>}]} {
    %c0 = arith.constant 0 : index
    %c0_0 = arith.constant 0 : index
    %c0_1 = arith.constant 0 : index
    %0 = vector.load %arg1[%c0, %c0_0, %c0_1] : memref<8x8x32xbf16, #tpu.memory_space<vmem>>, vector<8x8x32xbf16>
    %1 = arith.extf %0 : vector<8x8x32xbf16> to vector<8x8x32xf32>
    %c0_2 = arith.constant 0 : index
    %c0_3 = arith.constant 0 : index
    %2 = vector.load %arg3[%c0_2, %c0_3] : memref<1x32xf32, #tpu.memory_space<vmem>>, vector<1x32xf32>
    %3 = vector.shape_cast %2 : vector<1x32xf32> to vector<1x1x32xf32>
    %4 = vector.broadcast %3 : vector<1x1x32xf32> to vector<8x8x32xf32>
    %5 = arith.mulf %1, %4 : vector<8x8x32xf32>
    %cst = arith.constant dense<0.000000e+00> : vector<8x8xf32>
    %6 = vector.multi_reduction <add>, %5, %cst [2] : vector<8x8x32xf32> to vector<8x8xf32>
    %c0_4 = arith.constant 0 : index
    %c0_5 = arith.constant 0 : index
    %7 = vector.load %arg2[%c0_4, %c0_5] : memref<1x8xi32, #tpu.memory_space<vmem>>, vector<1x8xi32>
    %8 = tpu.iota {dimensions = array<i32: 0>} : vector<8x8xi32>
    %9 = vector.broadcast %7 : vector<1x8xi32> to vector<8x8xi32>
    %10 = arith.cmpi slt, %8, %9 : vector<8x8xi32>
    %cst_6 = arith.constant -1.000000e+30 : f32
    %11 = vector.broadcast %cst_6 : f32 to vector<8x8xf32>
    %12 = arith.select %10, %6, %11 : vector<8x8xi1>, vector<8x8xf32>
    %cst_7 = arith.constant dense<0xFF800000> : vector<8xf32>
    %13 = vector.multi_reduction <maximumf>, %12, %cst_7 [0] : vector<8x8xf32> to vector<8xf32>
    %14 = vector.shape_cast %13 : vector<8xf32> to vector<1x8xf32>
    %15 = vector.broadcast %14 : vector<1x8xf32> to vector<8x8xf32>
    %16 = arith.subf %12, %15 : vector<8x8xf32>
    %17 = math.exp %16 : vector<8x8xf32>
    %cst_8 = arith.constant 0.000000e+00 : f32
    %18 = vector.broadcast %cst_8 : f32 to vector<8x8xf32>
    %19 = arith.select %10, %17, %18 : vector<8x8xi1>, vector<8x8xf32>
    %cst_9 = arith.constant dense<0.000000e+00> : vector<8xf32>
    %20 = vector.multi_reduction <add>, %19, %cst_9 [0] : vector<8x8xf32> to vector<8xf32>
    %21 = vector.shape_cast %20 : vector<8xf32> to vector<1x8xf32>
    %cst_10 = arith.constant 1.000000e-30 : f32
    %22 = vector.broadcast %cst_10 : f32 to vector<1x8xf32>
    %23 = arith.maximumf %21, %22 : vector<1x8xf32>
    %24 = vector.broadcast %23 : vector<1x8xf32> to vector<8x8xf32>
    %25 = arith.divf %19, %24 : vector<8x8xf32>
    %26 = vector.shape_cast %25 : vector<8x8xf32> to vector<8x8x1xf32>
    %27 = vector.broadcast %26 : vector<8x8x1xf32> to vector<8x8x32xf32>
    %28 = arith.mulf %27, %1 : vector<8x8x32xf32>
    %cst_11 = arith.constant dense<0.000000e+00> : vector<8x32xf32>
    %29 = vector.multi_reduction <add>, %28, %cst_11 [0] : vector<8x8x32xf32> to vector<8x32xf32>
    %30 = vector.shape_cast %29 : vector<8x32xf32> to vector<1x8x32xf32>
    %31 = vector.broadcast %30 : vector<1x8x32xf32> to vector<8x8x32xf32>
    %32 = arith.mulf %1, %31 : vector<8x8x32xf32>
    %33 = vector.shape_cast %32 : vector<8x8x32xf32> to vector<64x32xf32>
    %34 = arith.truncf %33 : vector<64x32xf32> to vector<64x32xbf16>
    %c0_12 = arith.constant 0 : index
    %c0_13 = arith.constant 0 : index
    %35 = vector.load %arg4[%c0_12, %c0_13] : memref<32x32xbf16, #tpu.memory_space<vmem>>, vector<32x32xbf16>
    %cst_14 = arith.constant dense<0.000000e+00> : vector<64x32xf32>
    %36 = tpu.matmul %34, %35, %cst_14 {dimension_numbers = #tpu.dot_dimension_numbers<[1], [0], [0], [1], [0, 0, 1, 1], [], []>} : vector<64x32xbf16>, vector<32x32xbf16>, vector<64x32xf32> -> vector<64x32xf32>
    %c0_15 = arith.constant 0 : index
    %c0_16 = arith.constant 0 : index
    %37 = vector.load %arg5[%c0_15, %c0_16] : memref<1x32xf32, #tpu.memory_space<vmem>>, vector<1x32xf32>
    %38 = vector.broadcast %37 : vector<1x32xf32> to vector<64x32xf32>
    %39 = arith.addf %36, %38 : vector<64x32xf32>
    %cst_17 = arith.constant 0.000000e+00 : f32
    %40 = vector.broadcast %cst_17 : f32 to vector<64x32xf32>
    %41 = arith.maximumf %39, %40 : vector<64x32xf32>
    %42 = arith.truncf %41 : vector<64x32xf32> to vector<64x32xbf16>
    %c0_18 = arith.constant 0 : index
    %c0_19 = arith.constant 0 : index
    %43 = vector.load %arg6[%c0_18, %c0_19] : memref<32x8xbf16, #tpu.memory_space<vmem>>, vector<32x8xbf16>
    %cst_20 = arith.constant dense<0.000000e+00> : vector<64x8xf32>
    %44 = tpu.matmul %42, %43, %cst_20 {dimension_numbers = #tpu.dot_dimension_numbers<[1], [0], [0], [1], [0, 0, 1, 1], [], []>} : vector<64x32xbf16>, vector<32x8xbf16>, vector<64x8xf32> -> vector<64x8xf32>
    %c0_21 = arith.constant 0 : index
    %c0_22 = arith.constant 0 : index
    %45 = vector.load %arg7[%c0_21, %c0_22] : memref<1x8xf32, #tpu.memory_space<vmem>>, vector<1x8xf32>
    %46 = vector.broadcast %45 : vector<1x8xf32> to vector<64x8xf32>
    %47 = arith.addf %44, %46 : vector<64x8xf32>
    %cst_23 = arith.constant dense<0xFF800000> : vector<64xf32>
    %48 = vector.multi_reduction <maximumf>, %47, %cst_23 [1] : vector<64x8xf32> to vector<64xf32>
    %49 = vector.shape_cast %48 : vector<64xf32> to vector<64x1xf32>
    %50 = vector.broadcast %49 : vector<64x1xf32> to vector<64x8xf32>
    %51 = arith.subf %47, %50 : vector<64x8xf32>
    %52 = math.exp %51 : vector<64x8xf32>
    %cst_24 = arith.constant dense<0.000000e+00> : vector<64xf32>
    %53 = vector.multi_reduction <add>, %52, %cst_24 [1] : vector<64x8xf32> to vector<64xf32>
    %54 = vector.shape_cast %53 : vector<64xf32> to vector<64x1xf32>
    %55 = math.log %54 : vector<64x1xf32>
    %56 = vector.broadcast %55 : vector<64x1xf32> to vector<64x8xf32>
    %57 = arith.subf %51, %56 : vector<64x8xf32>
    %58 = vector.shape_cast %57 : vector<64x8xf32> to vector<8x8x8xf32>
    %c0_25 = arith.constant 0 : index
    %c0_26 = arith.constant 0 : index
    %c0_27 = arith.constant 0 : index
    %59 = vector.load %arg8[%c0_25, %c0_26, %c0_27] : memref<8x8x8xf32, #tpu.memory_space<vmem>>, vector<8x8x8xf32>
    tpu.vector_store %arg8[%c0_25, %c0_26, %c0_27], %58 {strides = array<i32>} : memref<8x8x8xf32, #tpu.memory_space<vmem>>, vector<8x8x8xf32>,
    return
  }
  func.func @transform_0(%arg0: i32) -> (i32, i32, i32) {
    %c0_i32 = arith.constant 0 : i32
    %c0_i32_0 = arith.constant 0 : i32
    %c0_i32_1 = arith.constant 0 : i32
    return %c0_i32, %arg0, %c0_i32_0 : i32, i32, i32
  }
  func.func @transform_1(%arg0: i32) -> (i32, i32) {
    %c0_i32 = arith.constant 0 : i32
    %c0_i32_0 = arith.constant 0 : i32
    return %c0_i32, %arg0 : i32, i32
  }
  func.func @transform_2(%arg0: i32) -> (i32, i32) {
    %c0_i32 = arith.constant 0 : i32
    %c0_i32_0 = arith.constant 0 : i32
    %c0_i32_1 = arith.constant 0 : i32
    return %c0_i32, %c0_i32_0 : i32, i32
  }
  func.func @transform_3(%arg0: i32) -> (i32, i32) {
    %c0_i32 = arith.constant 0 : i32
    %c0_i32_0 = arith.constant 0 : i32
    %c0_i32_1 = arith.constant 0 : i32
    return %c0_i32, %c0_i32_0 : i32, i32
  }
  func.func @transform_4(%arg0: i32) -> (i32, i32) {
    %c0_i32 = arith.constant 0 : i32
    %c0_i32_0 = arith.constant 0 : i32
    %c0_i32_1 = arith.constant 0 : i32
    return %c0_i32, %c0_i32_0 : i32, i32
  }
  func.func @transform_5(%arg0: i32) -> (i32, i32) {
    %c0_i32 = arith.constant 0 : i32
    %c0_i32_0 = arith.constant 0 : i32
    %c0_i32_1 = arith.constant 0 : i32
    return %c0_i32, %c0_i32_0 : i32, i32
  }
  func.func @transform_6(%arg0: i32) -> (i32, i32) {
    %c0_i32 = arith.constant 0 : i32
    %c0_i32_0 = arith.constant 0 : i32
    %c0_i32_1 = arith.constant 0 : i32
    return %c0_i32, %c0_i32_0 : i32, i32
  }
  func.func @transform_7(%arg0: i32) -> (i32, i32, i32) {
    %c0_i32 = arith.constant 0 : i32
    %c0_i32_0 = arith.constant 0 : i32
    %c0_i32_1 = arith.constant 0 : i32
    return %c0_i32, %arg0, %c0_i32_0 : i32, i32, i32
  }
}

module attributes {stable_mosaic.version = 11 : i64} {
  func.func @_sni_layer_kernel(%arg0: i32, %arg1: memref<8x8x32xbf16, #tpu.memory_space<vmem>>, %arg2: memref<1x8xi32, #tpu.memory_space<vmem>>, %arg3: memref<1x32xf32, #tpu.memory_space<vmem>>, %arg4: memref<32x32xbf16, #tpu.memory_space<vmem>>, %arg5: memref<1x32xf32, #tpu.memory_space<vmem>>, %arg6: memref<32x8xbf16, #tpu.memory_space<vmem>>, %arg7: memref<1x8xf32, #tpu.memory_space<vmem>>, %arg8: memref<8x8x8xf32, #tpu.memory_space<vmem>>) attributes {dimension_semantics = [#tpu.dimension_semantics<parallel>], iteration_bounds = array<i64: 1>, scalar_prefetch = 0 : i64, scratch_operands = 0 : i64, tpu.core_type = #tpu.core_type<tc>, window_params = [{transform_indices = @transform_0, window_bounds = array<i64: 8, 8, 32>}, {transform_indices = @transform_1, window_bounds = array<i64: 1, 8>}, {pipeline_mode = #tpu.pipeline_mode<synchronous>, transform_indices = @transform_2, window_bounds = array<i64: 1, 32>}, {pipeline_mode = #tpu.pipeline_mode<synchronous>, transform_indices = @transform_3, window_bounds = array<i64: 32, 32>}, {pipeline_mode = #tpu.pipeline_mode<synchronous>, transform_indices = @transform_4, window_bounds = array<i64: 1, 32>}, {pipeline_mode = #tpu.pipeline_mode<synchronous>, transform_indices = @transform_5, window_bounds = array<i64: 32, 8>}, {pipeline_mode = #tpu.pipeline_mode<synchronous>, transform_indices = @transform_6, window_bounds = array<i64: 1, 8>}, {transform_indices = @transform_7, window_bounds = array<i64: 8, 8, 8>}]} {
    %c0 = arith.constant 0 : index
    %c0_0 = arith.constant 0 : index
    %c0_1 = arith.constant 0 : index
    %0 = vector.load %arg1[%c0, %c0_0, %c0_1] : memref<8x8x32xbf16, #tpu.memory_space<vmem>>, vector<8x8x32xbf16>
    %1 = arith.extf %0 : vector<8x8x32xbf16> to vector<8x8x32xf32>
    %c0_2 = arith.constant 0 : index
    %c0_3 = arith.constant 0 : index
    %2 = vector.load %arg3[%c0_2, %c0_3] : memref<1x32xf32, #tpu.memory_space<vmem>>, vector<1x32xf32>
    %3 = vector.shape_cast %2 : vector<1x32xf32> to vector<1x1x32xf32>
    %4 = vector.broadcast %3 : vector<1x1x32xf32> to vector<8x8x32xf32>
    %5 = arith.mulf %1, %4 : vector<8x8x32xf32>
    %cst = arith.constant dense<0.000000e+00> : vector<8x8xf32>
    %6 = vector.multi_reduction <add>, %5, %cst [2] : vector<8x8x32xf32> to vector<8x8xf32>
    %c0_4 = arith.constant 0 : index
    %c0_5 = arith.constant 0 : index
    %7 = vector.load %arg2[%c0_4, %c0_5] : memref<1x8xi32, #tpu.memory_space<vmem>>, vector<1x8xi32>
    %8 = tpu.iota {dimensions = array<i32: 0>} : vector<8x8xi32>
    %9 = vector.broadcast %7 : vector<1x8xi32> to vector<8x8xi32>
    %10 = arith.cmpi slt, %8, %9 : vector<8x8xi32>
    %cst_6 = arith.constant -1.000000e+30 : f32
    %11 = vector.broadcast %cst_6 : f32 to vector<8x8xf32>
    %12 = arith.select %10, %6, %11 : vector<8x8xi1>, vector<8x8xf32>
    %cst_7 = arith.constant dense<0xFF800000> : vector<8xf32>
    %13 = vector.multi_reduction <maximumf>, %12, %cst_7 [0] : vector<8x8xf32> to vector<8xf32>
    %14 = vector.shape_cast %13 : vector<8xf32> to vector<1x8xf32>
    %15 = vector.broadcast %14 : vector<1x8xf32> to vector<8x8xf32>
    %16 = arith.subf %12, %15 : vector<8x8xf32>
    %17 = math.exp %16 : vector<8x8xf32>
    %cst_8 = arith.constant 0.000000e+00 : f32
    %18 = vector.broadcast %cst_8 : f32 to vector<8x8xf32>
    %19 = arith.select %10, %17, %18 : vector<8x8xi1>, vector<8x8xf32>
    %cst_9 = arith.constant dense<0.000000e+00> : vector<8xf32>
    %20 = vector.multi_reduction <add>, %19, %cst_9 [0] : vector<8x8xf32> to vector<8xf32>
    %21 = vector.shape_cast %20 : vector<8xf32> to vector<1x8xf32>
    %cst_10 = arith.constant 1.000000e-30 : f32
    %22 = vector.broadcast %cst_10 : f32 to vector<1x8xf32>
    %23 = arith.maximumf %21, %22 : vector<1x8xf32>
    %24 = vector.broadcast %23 : vector<1x8xf32> to vector<8x8xf32>
    %25 = arith.divf %19, %24 : vector<8x8xf32>
    %26 = vector.shape_cast %25 : vector<8x8xf32> to vector<8x8x1xf32>
    %27 = vector.broadcast %26 : vector<8x8x1xf32> to vector<8x8x32xf32>
    %28 = arith.mulf %27, %1 : vector<8x8x32xf32>
    %cst_11 = arith.constant dense<0.000000e+00> : vector<8x32xf32>
    %29 = vector.multi_reduction <add>, %28, %cst_11 [0] : vector<8x8x32xf32> to vector<8x32xf32>
    %30 = vector.shape_cast %29 : vector<8x32xf32> to vector<1x8x32xf32>
    %31 = vector.broadcast %30 : vector<1x8x32xf32> to vector<8x8x32xf32>
    %32 = arith.mulf %1, %31 : vector<8x8x32xf32>
    %33 = vector.shape_cast %32 : vector<8x8x32xf32> to vector<64x32xf32>
    %34 = arith.truncf %33 : vector<64x32xf32> to vector<64x32xbf16>
    %c0_12 = arith.constant 0 : index
    %c0_13 = arith.constant 0 : index
    %35 = vector.load %arg4[%c0_12, %c0_13] : memref<32x32xbf16, #tpu.memory_space<vmem>>, vector<32x32xbf16>
    %cst_14 = arith.constant dense<0.000000e+00> : vector<64x32xf32>
    %36 = tpu.matmul %34, %35, %cst_14 {dimension_numbers = #tpu.dot_dimension_numbers<[1], [0], [0], [1], [0, 0, 1, 1], [], []>} : vector<64x32xbf16>, vector<32x32xbf16>, vector<64x32xf32> -> vector<64x32xf32>
    %c0_15 = arith.constant 0 : index
    %c0_16 = arith.constant 0 : index
    %37 = vector.load %arg5[%c0_15, %c0_16] : memref<1x32xf32, #tpu.memory_space<vmem>>, vector<1x32xf32>
    %38 = vector.broadcast %37 : vector<1x32xf32> to vector<64x32xf32>
    %39 = arith.addf %36, %38 : vector<64x32xf32>
    %cst_17 = arith.constant 0.000000e+00 : f32
    %40 = vector.broadcast %cst_17 : f32 to vector<64x32xf32>
    %41 = arith.maximumf %39, %40 : vector<64x32xf32>
    %42 = arith.truncf %41 : vector<64x32xf32> to vector<64x32xbf16>
    %c0_18 = arith.constant 0 : index
    %c0_19 = arith.constant 0 : index
    %43 = vector.load %arg6[%c0_18, %c0_19] : memref<32x8xbf16, #tpu.memory_space<vmem>>, vector<32x8xbf16>
    %cst_20 = arith.constant dense<0.000000e+00> : vector<64x8xf32>
    %44 = tpu.matmul %42, %43, %cst_20 {dimension_numbers = #tpu.dot_dimension_numbers<[1], [0], [0], [1], [0, 0, 1, 1], [], []>} : vector<64x32xbf16>, vector<32x8xbf16>, vector<64x8xf32> -> vector<64x8xf32>
    %c0_21 = arith.constant 0 : index
    %c0_22 = arith.constant 0 : index
    %45 = vector.load %arg7[%c0_21, %c0_22] : memref<1x8xf32, #tpu.memory_space<vmem>>, vector<1x8xf32>
    %46 = vector.broadcast %45 : vector<1x8xf32> to vector<64x8xf32>
    %47 = arith.addf %44, %46 : vector<64x8xf32>
    %cst_23 = arith.constant dense<0xFF800000> : vector<64xf32>
    %48 = vector.multi_reduction <maximumf>, %47, %cst_23 [1] : vector<64x8xf32> to vector<64xf32>
    %49 = vector.shape_cast %48 : vector<64xf32> to vector<64x1xf32>
    %50 = vector.broadcast %49 : vector<64x1xf32> to vector<64x8xf32>
    %51 = arith.subf %47, %50 : vector<64x8xf32>
    %52 = math.exp %51 : vector<64x8xf32>
    %cst_24 = arith.constant dense<0.000000e+00> : vector<64xf32>
    %53 = vector.multi_reduction <add>, %52, %cst_24 [1] : vector<64x8xf32> to vector<64xf32>
    %54 = vector.shape_cast %53 : vector<64xf32> to vector<64x1xf32>
    %55 = math.log %54 : vector<64x1xf32>
    %56 = vector.broadcast %55 : vector<64x1xf32> to vector<64x8xf32>
    %57 = arith.subf %51, %56 : vector<64x8xf32>
    %58 = vector.shape_cast %57 : vector<64x8xf32> to vector<8x8x8xf32>
    %c0_25 = arith.constant 0 : index
    %c0_26 = arith.constant 0 : index
    %c0_27 = arith.constant 0 : index
    %59 = vector.load %arg8[%c0_25, %c0_26, %c0_27] : memref<8x8x8xf32, #tpu.memory_space<vmem>>, vector<8x8x8xf32>
    tpu.vector_store %arg8[%c0_25, %c0_26, %c0_27], %58 {strides = array<i32>} : memref<8x8x8xf32, #tpu.memory_space<vmem>>, vector<8x8x8xf32>,
    return
  }
  func.func @transform_0(%arg0: i32) -> (i32, i32, i32) {
    %c0_i32 = arith.constant 0 : i32
    %c0_i32_0 = arith.constant 0 : i32
    %c0_i32_1 = arith.constant 0 : i32
    return %c0_i32, %arg0, %c0_i32_0 : i32, i32, i32
  }
  func.func @transform_1(%arg0: i32) -> (i32, i32) {
    %c0_i32 = arith.constant 0 : i32
    %c0_i32_0 = arith.constant 0 : i32
    return %c0_i32, %arg0 : i32, i32
  }
  func.func @transform_2(%arg0: i32) -> (i32, i32) {
    %c0_i32 = arith.constant 0 : i32
    %c0_i32_0 = arith.constant 0 : i32
    %c0_i32_1 = arith.constant 0 : i32
    return %c0_i32, %c0_i32_0 : i32, i32
  }
  func.func @transform_3(%arg0: i32) -> (i32, i32) {
    %c0_i32 = arith.constant 0 : i32
    %c0_i32_0 = arith.constant 0 : i32
    %c0_i32_1 = arith.constant 0 : i32
    return %c0_i32, %c0_i32_0 : i32, i32
  }
  func.func @transform_4(%arg0: i32) -> (i32, i32) {
    %c0_i32 = arith.constant 0 : i32
    %c0_i32_0 = arith.constant 0 : i32
    %c0_i32_1 = arith.constant 0 : i32
    return %c0_i32, %c0_i32_0 : i32, i32
  }
  func.func @transform_5(%arg0: i32) -> (i32, i32) {
    %c0_i32 = arith.constant 0 : i32
    %c0_i32_0 = arith.constant 0 : i32
    %c0_i32_1 = arith.constant 0 : i32
    return %c0_i32, %c0_i32_0 : i32, i32
  }
  func.func @transform_6(%arg0: i32) -> (i32, i32) {
    %c0_i32 = arith.constant 0 : i32
    %c0_i32_0 = arith.constant 0 : i32
    %c0_i32_1 = arith.constant 0 : i32
    return %c0_i32, %c0_i32_0 : i32, i32
  }
  func.func @transform_7(%arg0: i32) -> (i32, i32, i32) {
    %c0_i32 = arith.constant 0 : i32
    %c0_i32_0 = arith.constant 0 : i32
    %c0_i32_1 = arith.constant 0 : i32
    return %c0_i32, %arg0, %c0_i32_0 : i32, i32, i32
  }
}

</mosaic_0001>

<bundles_post_ra>
// kernel: tpu_custom_call.1
= control target key start
LH: loop header
LB: loop body
LE: loop exit
PB: predicated region body
PF: predicated region fallthrough
CT: control target
= control target key end

     0   :  { %12 = vsyncpa [#allocation3], 0  ;;  %s985_s0 = inlined_call_operand.hbm [shape: bf16[8,8,32], index: 0, kind: input, shape index: {}]   ;;  %s986_s1 = inlined_call_operand.vmem [shape: s32[1,8], index: 1, kind: input, shape index: {}]   ;;  %s987_s2 = inlined_call_operand.vmem [shape: f32[1,32], index: 2, kind: input, shape index: {}]   ;;  %s988_s3 = inlined_call_operand.vmem [shape: bf16[32,32], index: 3, kind: input, shape index: {}]   ;;  %s989_s4 = inlined_call_operand.vmem [shape: f32[1,32], index: 4, kind: input, shape index: {}]   ;;  %s990_s5 = inlined_call_operand.vmem [shape: bf16[32,8], index: 5, kind: input, shape index: {}]   ;;  %s991_s6 = inlined_call_operand.vmem [shape: f32[1,8], index: 6, kind: input, shape index: {}]   ;;  %s992_s7 = inlined_call_operand.hbm [shape: f32[8,8,8], index: 7, kind: output, shape index: {}]  }
   0x1   :  { %13 = vsyncpa [#allocation4], 0  ;;  %s771_s24 = smov [#allocation2]  }
   0x2   :  { %s19_s25 = sshll.u32 %s771_s24, 4  ;;  %s20_s25 = int_to_ptr.vmem [resolvable:$true] %s19_s25 }
   0x3   :  { %s735_s26 = scalar_lea.vmem %s20_s25, 512  ;;  %p740_p1 = scmp.lt.s32.totalorder %s20_s25, %s20_s25 }
   0x4   :  { %p736_p0 = scmp.ne.s32.totalorder %s20_s25, %s735_s26  ;;  %p741_p2 = scmp.lt.s32.totalorder %s735_s26, %s735_s26 }
   0x6   :  { %p742_p3 = por %p741_p2, %p740_p1 }
   0x8   :  { %p743_p4 = pnand %p742_p3, %p736_p0 }
   0xa   :  { %746 = shalt.err (!%p743_p4)
}
   0xb   :  { %s772_s27 = smov 64   ;;  %s773_s28 = smov 4  }
   0xc   :  { %25 = dma.hbm_to_vmem [thread:$0]  %s985_s0, 512, %s20_s25, [#allocation3], %s772_s27, %s772_s27, %s773_s28  }
   0xd   :  { %767 = dma.done.wait [#allocation3], 512  }
   0xe   :  { %768 = vsyncadd [#allocation3], 4294966784  ;;  %v627_v0 = vld [vmem:[#allocation2] sm:$0xff]   ;;  %vm73_vm0 = vcmask 261120   ;;  %v642_v2 = vld [vmem:[#allocation2 + $0x8] sm:$0xff]   ;;  %v99_v29 = vlaneseq  ;;  %vm148_vm1 = vcmask 1041409  }
   0xf   :  { %v610_v1 = vld [vmem:[%s987_s2] ss:$0 sm:$0xff]  ;;  %v823_v3 = vunpack.c.l.bf16 %v627_v0  ;;  %v825_v4 = vunpack.c.l.bf16 %v642_v2  ;;  %v827_v5 = vunpack.c.h.bf16 %v627_v0  ;;  %v829_v6 = vunpack.c.h.bf16 %v642_v2  ;;  %v643_v7 = vld [vmem:[#allocation2 + $0x10] sm:$0xff]   ;;  %v644_v8 = vld [vmem:[#allocation2 + $0x18] sm:$0xff]  }
  0x10   :  { %v831_v9 = vunpack.c.l.bf16 %v643_v7  ;;  %v833_v10 = vunpack.c.h.bf16 %v643_v7  ;;  %v841_v17 = vunpack.c.l.bf16 %v644_v8  ;;  %v843_v18 = vunpack.c.h.bf16 %v644_v8  ;;  %v611_v49 = vld [vmem:[%s986_s1] ss:$0 sm:$0xff] }
  0x11   :  { %v65_v11 = vmul.f32 %v823_v3, %v610_v1  ;;  %v67_v12 = vmul.f32 %v825_v4, %v610_v1  ;;  %v66_v13 = vmul.f32 %v827_v5, %v610_v1  ;;  %v68_v14 = vmul.f32 %v829_v6, %v610_v1 }
  0x12   :  { %v69_v21 = vmul.f32 %v831_v9, %v610_v1  ;;  %v70_v22 = vmul.f32 %v833_v10, %v610_v1  ;;  %v71_v25 = vmul.f32 %v841_v17, %v610_v1  ;;  %v72_v26 = vmul.f32 %v843_v18, %v610_v1 }
  0x13   :  { %v74_v15 = vsel %vm73_vm0, %v65_v11, 0.0  ;;  %v80_v16 = vsel %vm73_vm0, %v67_v12, 0.0  ;;  %v77_v19 = vsel %vm73_vm0, %v66_v13, 0.0  ;;  %v83_v20 = vsel %vm73_vm0, %v68_v14, 0.0 }
  0x14   :  { %75 = vadd.xlane.f32.xlu0 %v74_v15  ;;  %81 = vadd.xlane.f32.xlu1 %v80_v16  ;;  %v86_v23 = vsel %vm73_vm0, %v69_v21, 0.0  ;;  %v89_v24 = vsel %vm73_vm0, %v70_v22, 0.0  ;;  %v92_v27 = vsel %vm73_vm0, %v71_v25, 0.0  ;;  %v95_v28 = vsel %vm73_vm0, %v72_v26, 0.0 }
  0x15   :  { %v855_v30 = vshrl.u32 %v99_v29, 7  ;;  %v115_v31 = vand.u32 127, %v99_v29  ;;  %vm150_vm2 = vcmask 1042434   ;;  %vm152_vm3 = vcmask 1043459  }
  0x16   :  { %vm154_vm4 = vcmask 1044484   ;;  %vm156_vm5 = vcmask 1045509   ;;  %vm158_vm6 = vcmask 1046534   ;;  %vm160_vm7 = vcmask 1047559  }
  0x17   :  { %v118_v34 = vsub.s32 %v115_v31, %v855_v30  ;;  %vm105_vm8 = vcmp.lt.s32.totalorder %v855_v30, %v611_v49  ;;  %vm164_vm9 = vcmask 64512   ;;  %v195_v21 = vsub.s32 1, %v855_v30 }
  0x18   :  { %78 = vadd.xlane.f32.xlu0 %v77_v19  ;;  %84 = vadd.xlane.f32.xlu1 %v83_v20  ;;  %v188_v22 = vsub.s32 0, %v855_v30 }
  0x1c   :  { %87 = vadd.xlane.f32.xlu0 %v86_v23  ;;  %90 = vadd.xlane.f32.xlu1 %v89_v24 }
  0x20   :  { %93 = vadd.xlane.f32.xlu0 %v92_v27  ;;  %96 = vadd.xlane.f32.xlu1 %v95_v28  ;;  %v202_v27 = vsub.s32 2, %v855_v30  ;;  %v216_v28 = vsub.s32 4, %v855_v30 }
  0x9d   :  { %v76_v32 = vpop.xlane.xlu0 %75  ;;  %v82_v33 = vpop.xlane.xlu1 %81 }
  0x9e   :  { %v119_v37 = vrot.slane %v76_v32, %v118_v34  ;;  %v127_v40 = vrot.slane %v82_v33, %v118_v34  ;;  %v209_v32 = vsub.s32 3, %v855_v30  ;;  %v230_v33 = vsub.s32 6, %v855_v30 }
  0xa1   :  { %v79_v35 = vpop.xlane.xlu0 %78  ;;  %v85_v36 = vpop.xlane.xlu1 %84 }
  0xa2   :  { %v123_v38 = vrot.slane %v79_v35, %v118_v34  ;;  %v131_v39 = vrot.slane %v85_v36, %v118_v34 }
  0xa4   :  { %v149_v41 = vsel %vm148_vm1, %v123_v38, %v119_v37  ;;  %v223_v37 = vsub.s32 5, %v855_v30  ;;  %v688_v38 = vld [vmem:[%s988_s3] sm:$0xff]  }
  0xa5   :  { %v151_v42 = vsel %vm150_vm2, %v127_v40, %v149_v41  ;;  %v88_v43 = vpop.xlane.xlu0 %87  ;;  %v91_v44 = vpop.xlane.xlu1 %90  ;;  %v237_v40 = vsub.s32 7, %v855_v30 }
  0xa6   :  { %v153_v45 = vsel %vm152_vm3, %v131_v39, %v151_v42  ;;  %v135_v46 = vrot.slane %v88_v43, %v118_v34  ;;  %v139_v47 = vrot.slane %v91_v44, %v118_v34 }
  0xa8   :  { %v155_v48 = vsel %vm154_vm4, %v135_v46, %v153_v45 }
  0xa9   :  { %v94_v50 = vpop.xlane.xlu0 %93  ;;  %v97_v51 = vpop.xlane.xlu1 %96  ;;  %v157_v54 = vsel %vm156_vm5, %v139_v47, %v155_v48 }
  0xaa   :  { %v143_v52 = vrot.slane %v94_v50, %v118_v34  ;;  %v147_v53 = vrot.slane %v97_v51, %v118_v34  ;;  %v687_v34 = vld [vmem:[%s988_s3 + $0x8] sm:$0xff]  }
  0xab   :  { %657 = vmatprep.subr.bf16.mxu0 %v687_v34 }
  0xac   :  { %v159_v55 = vsel %vm158_vm6, %v143_v52, %v157_v54  ;;  %658 = vmatpush3.bf16.msra.mxu0 %v687_v34 }
  0xad   :  { %v161_v56 = vsel %vm160_vm7, %v147_v53, %v159_v55  ;;  %659 = vmatprep.subr.bf16.mxu0 %v688_v38 }
  0xae   :  { %v163_v57 = vsel %vm105_vm8, %v161_v56, -1e+30 }
  0xaf   :  { %v165_v58 = vsel %vm164_vm9, %v163_v57, -inf }
  0xb0   :  { %v166_v59 = vrot.slane %v165_v58, 4  ;;  %660 = vmatpush3.bf16.msra.mxu0 %v688_v38 }
  0xb2   :  { %v167_v60 = vmax.f32 %v165_v58, %v166_v59 }
  0xb4   :  { %v168_v61 = vrot.slane %v167_v60, 2 }
  0xb6   :  { %v169_v62 = vmax.f32 %v167_v60, %v168_v61 }
  0xb8   :  { %v170_v63 = vrot.slane %v169_v62, 1 }
  0xba   :  { %v171_v0 = vmax.f32 %v169_v62, %v170_v63 }
  0xbc   :  { %v172_v1 = vsub.f32 %v163_v57, %v171_v0 }
  0xbe   :  { %v173_v2 = vmul.f32 1.442695, %v172_v1 }
  0xc0   :  { %691 = vpow2.f32 %v173_v2 }
  0xcd   :  { %v692_v7 = vpop.eup %691 }
  0xce   :  { %v175_v8 = vsel %vm105_vm8, %v692_v7, 0.0 }
  0xcf   :  { %v176_v11 = vsel %vm164_vm9, %v175_v8, 0.0 }
  0xd0   :  { %v177_v12 = vrot.slane %v176_v11, 4 }
  0xd2   :  { %v178_v13 = vadd.f32 %v177_v12, %v176_v11 }
  0xd4   :  { %v179_v14 = vrot.slane %v178_v13, 2 }
  0xd6   :  { %v180_v15 = vadd.f32 %v179_v14, %v178_v13 }
  0xd8   :  { %v181_v16 = vrot.slane %v180_v15, 1 }
  0xda   :  { %v182_v19 = vadd.f32 %v181_v16, %v180_v15 }
  0xdc   :  { %v183_v20 = vmax.f32 %v182_v19, 1e-30 }
  0xde   :  { %693 = vrcp.f32 %v183_v20 }
  0xeb   :  { %v694_v23 = vpop.eup %693 }
  0xec   :  { %v185_v24 = vmul.f32 %v694_v23, %v175_v8 }
  0xee   :  { %v196_v25 = vrot.slane %v185_v24, %v195_v21  ;;  %v189_v26 = vrot.slane %v185_v24, %v188_v22  ;;  %v203_v29 = vrot.slane %v185_v24, %v202_v27  ;;  %v217_v31 = vrot.slane %v185_v24, %v216_v28 }
  0xef   :  { %v210_v35 = vrot.slane %v185_v24, %v209_v32  ;;  %v231_v36 = vrot.slane %v185_v24, %v230_v33  ;;  %v224_v39 = vrot.slane %v185_v24, %v223_v37  ;;  %v238_v41 = vrot.slane %v185_v24, %v237_v40 }
  0xf0   :  { %198 = vbcast.lane.b32.xlu1 %v196_v25, 256  ;;  %191 = vbcast.lane.b32.xlu0 %v189_v26, 256 }
  0xf4   :  { %205 = vbcast.lane.b32.xlu1 %v203_v29, 256  ;;  %219 = vbcast.lane.b32.xlu0 %v217_v31, 256 }
  0xf8   :  { %212 = vbcast.lane.b32.xlu1 %v210_v35, 256  ;;  %233 = vbcast.lane.b32.xlu0 %v231_v36, 256 }
  0xfc   :  { %226 = vbcast.lane.b32.xlu1 %v224_v39, 256 }
 0x100   :  { %240 = vbcast.lane.b32.xlu1 %v238_v41, 256 }
 0x162   :  { %v199_v42 = vpop.permute.xlu1 %198  ;;  %v192_v43 = vpop.permute.xlu0 %191 }
 0x163   :  { %v243_v44 = vmul.f32 %v827_v5, %v199_v42  ;;  %v242_v45 = vmul.f32 %v823_v3, %v192_v43 }
 0x165   :  { %v251_v48 = vsel %vm73_vm0, %v243_v44, 0.0  ;;  %v250_v49 = vsel %vm73_vm0, %v242_v45, 0.0 }
 0x166   :  { %v206_v46 = vpop.permute.xlu1 %205  ;;  %v220_v47 = vpop.permute.xlu0 %219  ;;  %v252_v51 = vadd.f32 %v251_v48, %v250_v49 }
 0x167   :  { %v244_v50 = vmul.f32 %v825_v4, %v206_v46  ;;  %v246_v53 = vmul.f32 %v831_v9, %v220_v47 }
 0x169   :  { %v253_v30 = vsel %vm73_vm0, %v244_v50, 0.0  ;;  %v257_v60 = vsel %vm73_vm0, %v246_v53, 0.0 }
 0x16a   :  { %v213_v52 = vpop.permute.xlu1 %212  ;;  %v254_v55 = vadd.f32 %v253_v30, %v252_v51  ;;  %v234_v56 = vpop.permute.xlu0 %233  ;;  %v619_v51 = vld [vmem:[%s991_s6] ss:$0 sm:$0xff]  ;;  %s774_s6 = smov [#allocation5]  }
 0x16b   :  { %v245_v54 = vmul.f32 %v829_v6, %v213_v52  ;;  %v248_v61 = vmul.f32 %v841_v17, %v234_v56  ;;  %s598_s18 = sshll.u32 %s774_s6, 4  ;;  %s599_s18 = int_to_ptr.vmem [resolvable:$true] %s598_s18 }
 0x16c   :  { %s747_s19 = scalar_lea.vmem %s599_s18, 1024  ;;  %p752_p6 = scmp.lt.s32.totalorder %s599_s18, %s599_s18 }
 0x16d   :  { %v255_v57 = vsel %vm73_vm0, %v245_v54, 0.0  ;;  %v261_v7 = vsel %vm73_vm0, %v248_v61, 0.0  ;;  %p748_p5 = scmp.ne.s32.totalorder %s599_s18, %s747_s19  ;;  %p753_p7 = scmp.lt.s32.totalorder %s747_s19, %s747_s19 }
 0x16e   :  { %v256_v58 = vadd.f32 %v255_v57, %v254_v55  ;;  %v227_v59 = vpop.permute.xlu1 %226 }
 0x16f   :  { %v247_v62 = vmul.f32 %v833_v10, %v227_v59  ;;  %p754_p8 = por %p753_p7, %p752_p6 }
 0x170   :  { %v258_v63 = vadd.f32 %v257_v60, %v256_v58 }
 0x171   :  { %v259_v0 = vsel %vm73_vm0, %v247_v62, 0.0  ;;  %p755_p9 = pnand %p754_p8, %p748_p5 }
 0x172   :  { %v260_v1 = vadd.f32 %v259_v0, %v258_v63  ;;  %v241_v2 = vpop.permute.xlu1 %240 }
 0x173   :  { %v249_v8 = vmul.f32 %v843_v18, %v241_v2 }
 0x174   :  { %v262_v11 = vadd.f32 %v261_v7, %v260_v1 }
 0x175   :  { %v263_v12 = vsel %vm73_vm0, %v249_v8, 0.0 }
 0x176   :  { %v264_v13 = vadd.f32 %v263_v12, %v262_v11 }
 0x178   :  { %v265_v14 = vmul.f32 %v823_v3, %v264_v13  ;;  %v266_v15 = vmul.f32 %v827_v5, %v264_v13  ;;  %v267_v16 = vmul.f32 %v825_v4, %v264_v13  ;;  %v268_v19 = vmul.f32 %v829_v6, %v264_v13  ;;  %v689_v6 = vld [vmem:[%s990_s5 + $0x8] sm:$0xff]  }
 0x179   :  { %v269_v20 = vmul.f32 %v831_v9, %v264_v13  ;;  %v270_v21 = vmul.f32 %v833_v10, %v264_v13  ;;  %v271_v3 = vmul.f32 %v841_v17, %v264_v13  ;;  %v272_v5 = vmul.f32 %v843_v18, %v264_v13  ;;  %669 = vmatprep.subr.bf16.mxu1 %v689_v6  ;;  %v690_v9 = vld [vmem:[%s990_s5] sm:$0xff]  }
 0x17a   :  { %v273_v22 = vpack.c.bf16 %v266_v15, %v265_v14  ;;  %v274_v23 = vpack.c.bf16 %v268_v19, %v267_v16  ;;  %670 = vmatpush3.bf16.msra.mxu1 %v689_v6  ;;  %v612_v17 = vld [vmem:[%s989_s4] ss:$0 sm:$0xff] }
 0x17b   :  { %v275_v24 = vpack.c.bf16 %v270_v21, %v269_v20  ;;  %v276_v4 = vpack.c.bf16 %v272_v5, %v271_v3  ;;  %671 = vmatprep.subr.bf16.mxu1 %v690_v9 }
 0x17c   :  { %661 = vmatprep.mubr.msk.bf16.mxu0 %vm73_vm0, %v273_v22 }
 0x17d   :  { %662 = vmatmul.mubr.msk.bf16.vlgmr.msra.gmra.mxu0 %vm73_vm0, %v274_v23 }
 0x17e   :  { %665 = vmatprep.mubr.msk.bf16.mxu0 %vm73_vm0, %v275_v24  ;;  %672 = vmatpush3.bf16.msra.mxu1 %v690_v9 }
 0x185   :  { %666 = vmatmul.mubr.msk.bf16.gmra.mxu0 %vm73_vm0, %v276_v4 }
 0x23d   :  { %v663_v10 = vpop.f32.mrf.mxu0 }
 0x23e   :  { %v355_v28 = vadd.f32 %v663_v10, %v612_v17 }
 0x23f   :  { %v346_v25 = vpop.f32.mrf.mxu0 }
 0x240   :  { %v347_v26 = vadd.f32 %v612_v17, %v346_v25  ;;  %v379_v36 = vmax.f32 %v355_v28, 0.0 }
 0x241   :  { %v664_v18 = vpop.f32.mrf.mxu0 }
 0x242   :  { %v358_v27 = vadd.f32 %v664_v18, %v612_v17  ;;  %v377_v34 = vmax.f32 %v347_v26, 0.0 }
 0x243   :  { %v349_v29 = vpop.f32.mrf.mxu0 }
 0x244   :  { %v350_v31 = vadd.f32 %v612_v17, %v349_v29  ;;  %v380_v32 = vmax.f32 %v358_v27, 0.0 }
 0x245   :  { %v667_v33 = vpop.f32.mrf.mxu0 }
 0x246   :  { %v378_v35 = vmax.f32 %v350_v31, 0.0  ;;  %v386_v39 = vpack.c.bf16 %v380_v32, %v379_v36  ;;  %v371_v43 = vadd.f32 %v667_v33, %v612_v17 }
 0x247   :  { %v362_v37 = vpop.f32.mrf.mxu0 }
 0x248   :  { %v385_v38 = vpack.c.bf16 %v378_v35, %v377_v34  ;;  %v363_v41 = vadd.f32 %v612_v17, %v362_v37  ;;  %v383_v49 = vmax.f32 %v371_v43, 0.0 }
 0x249   :  { %v668_v40 = vpop.f32.mrf.mxu0 }
 0x24a   :  { %v374_v42 = vadd.f32 %v668_v40, %v612_v17  ;;  %673 = vmatprep.mubr.msk.bf16.mxu1 %vm73_vm0, %v385_v38  ;;  %v381_v47 = vmax.f32 %v363_v41, 0.0 }
 0x24b   :  { %v365_v44 = vpop.f32.mrf.mxu0  ;;  %674 = vmatmul.mubr.msk.bf16.vlgmr.msra.gmra.mxu1 %vm73_vm0, %v386_v39 }
 0x24c   :  { %v366_v45 = vadd.f32 %v612_v17, %v365_v44  ;;  %v384_v46 = vmax.f32 %v374_v42, 0.0 }
 0x24e   :  { %v382_v48 = vmax.f32 %v366_v45, 0.0  ;;  %v388_v30 = vpack.c.bf16 %v384_v46, %v383_v49 }
 0x250   :  { %v387_v50 = vpack.c.bf16 %v382_v48, %v381_v47 }
 0x252   :  { %677 = vmatprep.mubr.msk.bf16.mxu1 %vm73_vm0, %v387_v50 }
 0x253   :  { %678 = vmatmul.mubr.msk.bf16.gmra.mxu1 %vm73_vm0, %v388_v30 }
 0x30b   :  { %v675_v52 = vpop.f32.mrf.mxu1 }
 0x30c   :  { %v467_v53 = vadd.f32 %v675_v52, %v619_v51 }
 0x30d   :  { %v458_v54 = vpop.f32.mrf.mxu1 }
 0x30e   :  { %v459_v55 = vadd.f32 %v619_v51, %v458_v54  ;;  %v495_v56 = vsel %vm164_vm9, %v467_v53, -inf }
 0x30f   :  { %496 = vmax.xlane.f32.xlu0 %v495_v56  ;;  %v676_v57 = vpop.f32.mrf.mxu1 }
 0x310   :  { %v470_v59 = vadd.f32 %v676_v57, %v619_v51  ;;  %v489_v61 = vsel %vm164_vm9, %v459_v55, -inf }
 0x311   :  { %v461_v58 = vpop.f32.mrf.mxu1 }
 0x312   :  { %v462_v60 = vadd.f32 %v619_v51, %v461_v58  ;;  %v498_v2 = vsel %vm164_vm9, %v470_v59, -inf }
 0x313   :  { %v679_v62 = vpop.f32.mrf.mxu1  ;;  %490 = vmax.xlane.f32.xlu0 %v489_v61 }
 0x314   :  { %v492_v63 = vsel %vm164_vm9, %v462_v60, -inf  ;;  %v483_v11 = vadd.f32 %v679_v62, %v619_v51 }
 0x315   :  { %v474_v0 = vpop.f32.mrf.mxu1  ;;  %493 = vmax.xlane.f32.xlu1 %v492_v63 }
 0x316   :  { %v475_v1 = vadd.f32 %v619_v51, %v474_v0  ;;  %v507_v16 = vsel %vm164_vm9, %v483_v11, -inf }
 0x317   :  { %v680_v7 = vpop.f32.mrf.mxu1  ;;  %499 = vmax.xlane.f32.xlu0 %v498_v2 }
 0x318   :  { %v501_v13 = vsel %vm164_vm9, %v475_v1, -inf  ;;  %v486_v14 = vadd.f32 %v680_v7, %v619_v51 }
 0x319   :  { %v477_v8 = vpop.f32.mrf.mxu1 }
 0x31a   :  { %v478_v12 = vadd.f32 %v619_v51, %v477_v8  ;;  %v510_v19 = vsel %vm164_vm9, %v486_v14, -inf }
 0x31b   :  { %502 = vmax.xlane.f32.xlu0 %v501_v13 }
 0x31c   :  { %v504_v15 = vsel %vm164_vm9, %v478_v12, -inf }
 0x31d   :  { %505 = vmax.xlane.f32.xlu1 %v504_v15 }
 0x31f   :  { %508 = vmax.xlane.f32.xlu0 %v507_v16 }
 0x321   :  { %511 = vmax.xlane.f32.xlu1 %v510_v19 }
 0x398   :  { %v497_v20 = vpop.xlane.xlu0 %496 }
 0x399   :  { %v934_v21 = vsub.f32 %v467_v53, %v497_v20 }
 0x39b   :  { %v525_v22 = vmul.f32 1.442695, %v934_v21 }
 0x39c   :  { %v491_v23 = vpop.xlane.xlu0 %490 }
 0x39d   :  { %695 = vpow2.f32 %v525_v22  ;;  %v937_v24 = vsub.f32 %v459_v55, %v491_v23 }
 0x39e   :  { %v494_v3 = vpop.xlane.xlu1 %493 }
 0x39f   :  { %v521_v5 = vmul.f32 1.442695, %v937_v24  ;;  %v940_v4 = vsub.f32 %v462_v60, %v494_v3 }
 0x3a0   :  { %v500_v6 = vpop.xlane.xlu0 %499 }
 0x3a1   :  { %697 = vpow2.f32 %v521_v5  ;;  %v942_v9 = vsub.f32 %v470_v59, %v500_v6  ;;  %v523_v10 = vmul.f32 1.442695, %v940_v4 }
 0x3a3   :  { %v527_v25 = vmul.f32 1.442695, %v942_v9 }
 0x3a4   :  { %v503_v17 = vpop.xlane.xlu0 %502 }
 0x3a5   :  { %699 = vpow2.f32 %v527_v25  ;;  %v946_v18 = vsub.f32 %v475_v1, %v503_v17 }
 0x3a6   :  { %v506_v26 = vpop.xlane.xlu1 %505  ;;  %701 = vpow2.f32 %v523_v10 }
 0x3a7   :  { %v529_v27 = vmul.f32 1.442695, %v946_v18  ;;  %v949_v28 = vsub.f32 %v478_v12, %v506_v26 }
 0x3a8   :  { %v509_v29 = vpop.xlane.xlu0 %508 }
 0x3a9   :  { %703 = vpow2.f32 %v529_v27  ;;  %v531_v31 = vmul.f32 1.442695, %v949_v28  ;;  %v952_v32 = vsub.f32 %v483_v11, %v509_v29 }
 0x3aa   :  { %v696_v33 = vpop.eup %695  ;;  %v512_v34 = vpop.xlane.xlu1 %511 }
 0x3ab   :  { %705 = vpow2.f32 %v531_v31  ;;  %v533_v35 = vmul.f32 1.442695, %v952_v32  ;;  %v955_v36 = vsub.f32 %v486_v14, %v512_v34  ;;  %v543_v37 = vsel %vm164_vm9, %v696_v33, 0.0 }
 0x3ac   :  { %544 = vadd.xlane.f32.xlu0 %v543_v37 }
 0x3ad   :  { %707 = vpow2.f32 %v533_v35  ;;  %v535_v38 = vmul.f32 1.442695, %v955_v36 }
 0x3ae   :  { %v698_v39 = vpop.eup %697 }
 0x3af   :  { %709 = vpow2.f32 %v535_v38  ;;  %v537_v40 = vsel %vm164_vm9, %v698_v39, 0.0 }
 0x3b0   :  { %538 = vadd.xlane.f32.xlu0 %v537_v40 }
 0x3b2   :  { %v700_v41 = vpop.eup %699 }
 0x3b3   :  { %v546_v42 = vsel %vm164_vm9, %v700_v41, 0.0  ;;  %v702_v43 = vpop.eup %701 }
 0x3b4   :  { %547 = vadd.xlane.f32.xlu1 %v546_v42  ;;  %v540_v45 = vsel %vm164_vm9, %v702_v43, 0.0 }
 0x3b6   :  { %v704_v44 = vpop.eup %703 }
 0x3b7   :  { %v549_v46 = vsel %vm164_vm9, %v704_v44, 0.0 }
 0x3b8   :  { %v706_v47 = vpop.eup %705  ;;  %541 = vadd.xlane.f32.xlu1 %v540_v45  ;;  %550 = vadd.xlane.f32.xlu0 %v549_v46 }
 0x3b9   :  { %v552_v49 = vsel %vm164_vm9, %v706_v47, 0.0 }
 0x3ba   :  { %v708_v48 = vpop.eup %707 }
 0x3bb   :  { %v555_v50 = vsel %vm164_vm9, %v708_v48, 0.0 }
 0x3bc   :  { %v710_v30 = vpop.eup %709  ;;  %553 = vadd.xlane.f32.xlu1 %v552_v49  ;;  %556 = vadd.xlane.f32.xlu0 %v555_v50 }
 0x3bd   :  { %v558_v51 = vsel %vm164_vm9, %v710_v30, 0.0 }
 0x3c0   :  { %559 = vadd.xlane.f32.xlu1 %v558_v51 }
 0x435   :  { %v545_v52 = vpop.xlane.xlu0 %544 }
 0x436   :  { %711 = vlog2.f32 %v545_v52 }
 0x439   :  { %v539_v53 = vpop.xlane.xlu0 %538 }
 0x43a   :  { %713 = vlog2.f32 %v539_v53 }
 0x43d   :  { %v548_v54 = vpop.xlane.xlu1 %547 }
 0x43e   :  { %715 = vlog2.f32 %v548_v54 }
 0x441   :  { %v542_v55 = vpop.xlane.xlu1 %541  ;;  %v551_v56 = vpop.xlane.xlu0 %550 }
 0x442   :  { %717 = vlog2.f32 %v542_v55 }
 0x443   :  { %v712_v57 = vpop.eup %711  ;;  %719 = vlog2.f32 %v551_v56 }
 0x444   :  { %v566_v58 = vmul.f32 0.6931472, %v712_v57 }
 0x445   :  { %v554_v59 = vpop.xlane.xlu1 %553  ;;  %v557_v60 = vpop.xlane.xlu0 %556 }
 0x446   :  { %v579_v61 = vsub.f32 %v934_v21, %v566_v58  ;;  %721 = vlog2.f32 %v554_v59 }
 0x447   :  { %v714_v62 = vpop.eup %713  ;;  %723 = vlog2.f32 %v557_v60 }
 0x448   :  { %587 = vst.msk [vmem:[#allocation5 + $0x10] sm:$0xff] %vm164_vm9, %v579_v61  ;;  %v562_v63 = vmul.f32 0.6931472, %v714_v62 }
 0x449   :  { %v560_v0 = vpop.xlane.xlu1 %559 }
 0x44a   :  { %v577_v1 = vsub.f32 %v937_v24, %v562_v63  ;;  %725 = vlog2.f32 %v560_v0 }
 0x44b   :  { %v716_v2 = vpop.eup %715 }
 0x44c   :  { %585 = vst.msk [vmem:[#allocation5] sm:$0xff] %vm164_vm9, %v577_v1  ;;  %v568_v7 = vmul.f32 0.6931472, %v716_v2 }
 0x44e   :  { %v580_v8 = vsub.f32 %v942_v9, %v568_v7 }
 0x44f   :  { %v718_v11 = vpop.eup %717 }
 0x450   :  { %v720_v12 = vpop.eup %719  ;;  %588 = vst.msk [vmem:[#allocation5 + $0x18] sm:$0xff] %vm164_vm9, %v580_v8  ;;  %v564_v13 = vmul.f32 0.6931472, %v718_v11 }
 0x451   :  { %v570_v14 = vmul.f32 0.6931472, %v720_v12 }
 0x452   :  { %v578_v15 = vsub.f32 %v940_v4, %v564_v13 }
 0x453   :  { %v722_v16 = vpop.eup %721  ;;  %v581_v19 = vsub.f32 %v946_v18, %v570_v14 }
 0x454   :  { %v724_v20 = vpop.eup %723  ;;  %586 = vst.msk [vmem:[#allocation5 + $0x8] sm:$0xff] %vm164_vm9, %v578_v15  ;;  %v572_v21 = vmul.f32 0.6931472, %v722_v16 }
 0x455   :  { %589 = vst.msk [vmem:[#allocation5 + $0x20] sm:$0xff] %vm164_vm9, %v581_v19  ;;  %v574_v22 = vmul.f32 0.6931472, %v724_v20 }
 0x456   :  { %v582_v23 = vsub.f32 %v949_v28, %v572_v21 }
 0x457   :  { %v726_v24 = vpop.eup %725  ;;  %v583_v3 = vsub.f32 %v952_v32, %v574_v22 }
 0x458   :  { %590 = vst.msk [vmem:[#allocation5 + $0x28] sm:$0xff] %vm164_vm9, %v582_v23  ;;  %v576_v5 = vmul.f32 0.6931472, %v726_v24 }
 0x459   :  { %591 = vst.msk [vmem:[#allocation5 + $0x30] sm:$0xff] %vm164_vm9, %v583_v3 }
 0x45a   :  { %v584_v4 = vsub.f32 %v955_v36, %v576_v5 }
 0x45c   :  { %592 = vst.msk [vmem:[#allocation5 + $0x38] sm:$0xff] %vm164_vm9, %v584_v4 }
 0x45d   :  { %758 = shalt.err (!%p755_p9)
}
 0x45e   :  { %s775_s20 = smov 128   ;;  %s776_s21 = smov 8  }
 0x45f   :  { %604 = dma.vmem_to_hbm [thread:$0]  %s599_s18, 1024, %s992_s7, [#allocation4], %s775_s20, %s775_s20, %s776_s21  }
 0x460   :  { %769 = dma.done.wait [#allocation4], 1024  }
 0x461   :  { %770 = vsyncadd [#allocation4], 4294966272 }
 0x462   :  { %608 = vsyncpa [#allocation3], 1 }
 0x463   :  { %609 = vsyncpa [#allocation4], 1 }

// kernel: tpu_custom_call.1
= control target key start
LH: loop header
LB: loop body
LE: loop exit
PB: predicated region body
PF: predicated region fallthrough
CT: control target
= control target key end

     0   :  { %12 = vsyncpa [#allocation3], 0  ;;  %s985_s0 = inlined_call_operand.hbm [shape: bf16[8,8,32], index: 0, kind: input, shape index: {}]   ;;  %s986_s1 = inlined_call_operand.vmem [shape: s32[1,8], index: 1, kind: input, shape index: {}]   ;;  %s987_s2 = inlined_call_operand.vmem [shape: f32[1,32], index: 2, kind: input, shape index: {}]   ;;  %s988_s3 = inlined_call_operand.vmem [shape: bf16[32,32], index: 3, kind: input, shape index: {}]   ;;  %s989_s4 = inlined_call_operand.vmem [shape: f32[1,32], index: 4, kind: input, shape index: {}]   ;;  %s990_s5 = inlined_call_operand.vmem [shape: bf16[32,8], index: 5, kind: input, shape index: {}]   ;;  %s991_s6 = inlined_call_operand.vmem [shape: f32[1,8], index: 6, kind: input, shape index: {}]   ;;  %s992_s7 = inlined_call_operand.hbm [shape: f32[8,8,8], index: 7, kind: output, shape index: {}]  }
   0x1   :  { %13 = vsyncpa [#allocation4], 0  ;;  %s771_s24 = smov [#allocation2]  }
   0x2   :  { %s19_s25 = sshll.u32 %s771_s24, 4  ;;  %s20_s25 = int_to_ptr.vmem [resolvable:$true] %s19_s25 }
   0x3   :  { %s735_s26 = scalar_lea.vmem %s20_s25, 512  ;;  %p740_p1 = scmp.lt.s32.totalorder %s20_s25, %s20_s25 }
   0x4   :  { %p736_p0 = scmp.ne.s32.totalorder %s20_s25, %s735_s26  ;;  %p741_p2 = scmp.lt.s32.totalorder %s735_s26, %s735_s26 }
   0x6   :  { %p742_p3 = por %p741_p2, %p740_p1 }
   0x8   :  { %p743_p4 = pnand %p742_p3, %p736_p0 }
   0xa   :  { %746 = shalt.err (!%p743_p4)
}
   0xb   :  { %s772_s27 = smov 64   ;;  %s773_s28 = smov 4  }
   0xc   :  { %25 = dma.hbm_to_vmem [thread:$0]  %s985_s0, 512, %s20_s25, [#allocation3], %s772_s27, %s772_s27, %s773_s28  }
   0xd   :  { %767 = dma.done.wait [#allocation3], 512  }
   0xe   :  { %768 = vsyncadd [#allocation3], 4294966784  ;;  %v627_v0 = vld [vmem:[#allocation2] sm:$0xff]   ;;  %vm73_vm0 = vcmask 261120   ;;  %v642_v2 = vld [vmem:[#allocation2 + $0x8] sm:$0xff]   ;;  %v99_v29 = vlaneseq  ;;  %vm148_vm1 = vcmask 1041409  }
   0xf   :  { %v610_v1 = vld [vmem:[%s987_s2] ss:$0 sm:$0xff]  ;;  %v823_v3 = vunpack.c.l.bf16 %v627_v0  ;;  %v825_v4 = vunpack.c.l.bf16 %v642_v2  ;;  %v827_v5 = vunpack.c.h.bf16 %v627_v0  ;;  %v829_v6 = vunpack.c.h.bf16 %v642_v2  ;;  %v643_v7 = vld [vmem:[#allocation2 + $0x10] sm:$0xff]   ;;  %v644_v8 = vld [vmem:[#allocation2 + $0x18] sm:$0xff]  }
  0x10   :  { %v831_v9 = vunpack.c.l.bf16 %v643_v7  ;;  %v833_v10 = vunpack.c.h.bf16 %v643_v7  ;;  %v841_v17 = vunpack.c.l.bf16 %v644_v8  ;;  %v843_v18 = vunpack.c.h.bf16 %v644_v8  ;;  %v611_v49 = vld [vmem:[%s986_s1] ss:$0 sm:$0xff] }
  0x11   :  { %v65_v11 = vmul.f32 %v823_v3, %v610_v1  ;;  %v67_v12 = vmul.f32 %v825_v4, %v610_v1  ;;  %v66_v13 = vmul.f32 %v827_v5, %v610_v1  ;;  %v68_v14 = vmul.f32 %v829_v6, %v610_v1 }
  0x12   :  { %v69_v21 = vmul.f32 %v831_v9, %v610_v1  ;;  %v70_v22 = vmul.f32 %v833_v10, %v610_v1  ;;  %v71_v25 = vmul.f32 %v841_v17, %v610_v1  ;;  %v72_v26 = vmul.f32 %v843_v18, %v610_v1 }
  0x13   :  { %v74_v15 = vsel %vm73_vm0, %v65_v11, 0.0  ;;  %v80_v16 = vsel %vm73_vm0, %v67_v12, 0.0  ;;  %v77_v19 = vsel %vm73_vm0, %v66_v13, 0.0  ;;  %v83_v20 = vsel %vm73_vm0, %v68_v14, 0.0 }
  0x14   :  { %75 = vadd.xlane.f32.xlu0 %v74_v15  ;;  %81 = vadd.xlane.f32.xlu1 %v80_v16  ;;  %v86_v23 = vsel %vm73_vm0, %v69_v21, 0.0  ;;  %v89_v24 = vsel %vm73_vm0, %v70_v22, 0.0  ;;  %v92_v27 = vsel %vm73_vm0, %v71_v25, 0.0  ;;  %v95_v28 = vsel %vm73_vm0, %v72_v26, 0.0 }
  0x15   :  { %v855_v30 = vshrl.u32 %v99_v29, 7  ;;  %v115_v31 = vand.u32 127, %v99_v29  ;;  %vm150_vm2 = vcmask 1042434   ;;  %vm152_vm3 = vcmask 1043459  }
  0x16   :  { %vm154_vm4 = vcmask 1044484   ;;  %vm156_vm5 = vcmask 1045509   ;;  %vm158_vm6 = vcmask 1046534   ;;  %vm160_vm7 = vcmask 1047559  }
  0x17   :  { %v118_v34 = vsub.s32 %v115_v31, %v855_v30  ;;  %vm105_vm8 = vcmp.lt.s32.totalorder %v855_v30, %v611_v49  ;;  %vm164_vm9 = vcmask 64512   ;;  %v195_v21 = vsub.s32 1, %v855_v30 }
  0x18   :  { %78 = vadd.xlane.f32.xlu0 %v77_v19  ;;  %84 = vadd.xlane.f32.xlu1 %v83_v20  ;;  %v188_v22 = vsub.s32 0, %v855_v30 }
  0x1c   :  { %87 = vadd.xlane.f32.xlu0 %v86_v23  ;;  %90 = vadd.xlane.f32.xlu1 %v89_v24 }
  0x20   :  { %93 = vadd.xlane.f32.xlu0 %v92_v27  ;;  %96 = vadd.xlane.f32.xlu1 %v95_v28  ;;  %v202_v27 = vsub.s32 2, %v855_v30  ;;  %v216_v28 = vsub.s32 4, %v855_v30 }
  0x9d   :  { %v76_v32 = vpop.xlane.xlu0 %75  ;;  %v82_v33 = vpop.xlane.xlu1 %81 }
  0x9e   :  { %v119_v37 = vrot.slane %v76_v32, %v118_v34  ;;  %v127_v40 = vrot.slane %v82_v33, %v118_v34  ;;  %v209_v32 = vsub.s32 3, %v855_v30  ;;  %v230_v33 = vsub.s32 6, %v855_v30 }
  0xa1   :  { %v79_v35 = vpop.xlane.xlu0 %78  ;;  %v85_v36 = vpop.xlane.xlu1 %84 }
  0xa2   :  { %v123_v38 = vrot.slane %v79_v35, %v118_v34  ;;  %v131_v39 = vrot.slane %v85_v36, %v118_v34 }
  0xa4   :  { %v149_v41 = vsel %vm148_vm1, %v123_v38, %v119_v37  ;;  %v223_v37 = vsub.s32 5, %v855_v30  ;;  %v688_v38 = vld [vmem:[%s988_s3] sm:$0xff]  }
  0xa5   :  { %v151_v42 = vsel %vm150_vm2, %v127_v40, %v149_v41  ;;  %v88_v43 = vpop.xlane.xlu0 %87  ;;  %v91_v44 = vpop.xlane.xlu1 %90  ;;  %v237_v40 = vsub.s32 7, %v855_v30 }
  0xa6   :  { %v153_v45 = vsel %vm152_vm3, %v131_v39, %v151_v42  ;;  %v135_v46 = vrot.slane %v88_v43, %v118_v34  ;;  %v139_v47 = vrot.slane %v91_v44, %v118_v34 }
  0xa8   :  { %v155_v48 = vsel %vm154_vm4, %v135_v46, %v153_v45 }
  0xa9   :  { %v94_v50 = vpop.xlane.xlu0 %93  ;;  %v97_v51 = vpop.xlane.xlu1 %96  ;;  %v157_v54 = vsel %vm156_vm5, %v139_v47, %v155_v48 }
  0xaa   :  { %v143_v52 = vrot.slane %v94_v50, %v118_v34  ;;  %v147_v53 = vrot.slane %v97_v51, %v118_v34  ;;  %v687_v34 = vld [vmem:[%s988_s3 + $0x8] sm:$0xff]  }
  0xab   :  { %657 = vmatprep.subr.bf16.mxu0 %v687_v34 }
  0xac   :  { %v159_v55 = vsel %vm158_vm6, %v143_v52, %v157_v54  ;;  %658 = vmatpush3.bf16.msra.mxu0 %v687_v34 }
  0xad   :  { %v161_v56 = vsel %vm160_vm7, %v147_v53, %v159_v55  ;;  %659 = vmatprep.subr.bf16.mxu0 %v688_v38 }
  0xae   :  { %v163_v57 = vsel %vm105_vm8, %v161_v56, -1e+30 }
  0xaf   :  { %v165_v58 = vsel %vm164_vm9, %v163_v57, -inf }
  0xb0   :  { %v166_v59 = vrot.slane %v165_v58, 4  ;;  %660 = vmatpush3.bf16.msra.mxu0 %v688_v38 }
  0xb2   :  { %v167_v60 = vmax.f32 %v165_v58, %v166_v59 }
  0xb4   :  { %v168_v61 = vrot.slane %v167_v60, 2 }
  0xb6   :  { %v169_v62 = vmax.f32 %v167_v60, %v168_v61 }
  0xb8   :  { %v170_v63 = vrot.slane %v169_v62, 1 }
  0xba   :  { %v171_v0 = vmax.f32 %v169_v62, %v170_v63 }
  0xbc   :  { %v172_v1 = vsub.f32 %v163_v57, %v171_v0 }
  0xbe   :  { %v173_v2 = vmul.f32 1.442695, %v172_v1 }
  0xc0   :  { %691 = vpow2.f32 %v173_v2 }
  0xcd   :  { %v692_v7 = vpop.eup %691 }
  0xce   :  { %v175_v8 = vsel %vm105_vm8, %v692_v7, 0.0 }
  0xcf   :  { %v176_v11 = vsel %vm164_vm9, %v175_v8, 0.0 }
  0xd0   :  { %v177_v12 = vrot.slane %v176_v11, 4 }
  0xd2   :  { %v178_v13 = vadd.f32 %v177_v12, %v176_v11 }
  0xd4   :  { %v179_v14 = vrot.slane %v178_v13, 2 }
  0xd6   :  { %v180_v15 = vadd.f32 %v179_v14, %v178_v13 }
  0xd8   :  { %v181_v16 = vrot.slane %v180_v15, 1 }
  0xda   :  { %v182_v19 = vadd.f32 %v181_v16, %v180_v15 }
  0xdc   :  { %v183_v20 = vmax.f32 %v182_v19, 1e-30 }
  0xde   :  { %693 = vrcp.f32 %v183_v20 }
  0xeb   :  { %v694_v23 = vpop.eup %693 }
  0xec   :  { %v185_v24 = vmul.f32 %v694_v23, %v175_v8 }
  0xee   :  { %v196_v25 = vrot.slane %v185_v24, %v195_v21  ;;  %v189_v26 = vrot.slane %v185_v24, %v188_v22  ;;  %v203_v29 = vrot.slane %v185_v24, %v202_v27  ;;  %v217_v31 = vrot.slane %v185_v24, %v216_v28 }
  0xef   :  { %v210_v35 = vrot.slane %v185_v24, %v209_v32  ;;  %v231_v36 = vrot.slane %v185_v24, %v230_v33  ;;  %v224_v39 = vrot.slane %v185_v24, %v223_v37  ;;  %v238_v41 = vrot.slane %v185_v24, %v237_v40 }
  0xf0   :  { %198 = vbcast.lane.b32.xlu1 %v196_v25, 256  ;;  %191 = vbcast.lane.b32.xlu0 %v189_v26, 256 }
  0xf4   :  { %205 = vbcast.lane.b32.xlu1 %v203_v29, 256  ;;  %219 = vbcast.lane.b32.xlu0 %v217_v31, 256 }
  0xf8   :  { %212 = vbcast.lane.b32.xlu1 %v210_v35, 256  ;;  %233 = vbcast.lane.b32.xlu0 %v231_v36, 256 }
  0xfc   :  { %226 = vbcast.lane.b32.xlu1 %v224_v39, 256 }
 0x100   :  { %240 = vbcast.lane.b32.xlu1 %v238_v41, 256 }
 0x162   :  { %v199_v42 = vpop.permute.xlu1 %198  ;;  %v192_v43 = vpop.permute.xlu0 %191 }
 0x163   :  { %v243_v44 = vmul.f32 %v827_v5, %v199_v42  ;;  %v242_v45 = vmul.f32 %v823_v3, %v192_v43 }
 0x165   :  { %v251_v48 = vsel %vm73_vm0, %v243_v44, 0.0  ;;  %v250_v49 = vsel %vm73_vm0, %v242_v45, 0.0 }
 0x166   :  { %v206_v46 = vpop.permute.xlu1 %205  ;;  %v220_v47 = vpop.permute.xlu0 %219  ;;  %v252_v51 = vadd.f32 %v251_v48, %v250_v49 }
 0x167   :  { %v244_v50 = vmul.f32 %v825_v4, %v206_v46  ;;  %v246_v53 = vmul.f32 %v831_v9, %v220_v47 }
 0x169   :  { %v253_v30 = vsel %vm73_vm0, %v244_v50, 0.0  ;;  %v257_v60 = vsel %vm73_vm0, %v246_v53, 0.0 }
 0x16a   :  { %v213_v52 = vpop.permute.xlu1 %212  ;;  %v254_v55 = vadd.f32 %v253_v30, %v252_v51  ;;  %v234_v56 = vpop.permute.xlu0 %233  ;;  %v619_v51 = vld [vmem:[%s991_s6] ss:$0 sm:$0xff]  ;;  %s774_s6 = smov [#allocation5]  }
 0x16b   :  { %v245_v54 = vmul.f32 %v829_v6, %v213_v52  ;;  %v248_v61 = vmul.f32 %v841_v17, %v234_v56  ;;  %s598_s18 = sshll.u32 %s774_s6, 4  ;;  %s599_s18 = int_to_ptr.vmem [resolvable:$true] %s598_s18 }
 0x16c   :  { %s747_s19 = scalar_lea.vmem %s599_s18, 1024  ;;  %p752_p6 = scmp.lt.s32.totalorder %s599_s18, %s599_s18 }
 0x16d   :  { %v255_v57 = vsel %vm73_vm0, %v245_v54, 0.0  ;;  %v261_v7 = vsel %vm73_vm0, %v248_v61, 0.0  ;;  %p748_p5 = scmp.ne.s32.totalorder %s599_s18, %s747_s19  ;;  %p753_p7 = scmp.lt.s32.totalorder %s747_s19, %s747_s19 }
 0x16e   :  { %v256_v58 = vadd.f32 %v255_v57, %v254_v55  ;;  %v227_v59 = vpop.permute.xlu1 %226 }
 0x16f   :  { %v247_v62 = vmul.f32 %v833_v10, %v227_v59  ;;  %p754_p8 = por %p753_p7, %p752_p6 }
 0x170   :  { %v258_v63 = vadd.f32 %v257_v60, %v256_v58 }
 0x171   :  { %v259_v0 = vsel %vm73_vm0, %v247_v62, 0.0  ;;  %p755_p9 = pnand %p754_p8, %p748_p5 }
 0x172   :  { %v260_v1 = vadd.f32 %v259_v0, %v258_v63  ;;  %v241_v2 = vpop.permute.xlu1 %240 }
 0x173   :  { %v249_v8 = vmul.f32 %v843_v18, %v241_v2 }
 0x174   :  { %v262_v11 = vadd.f32 %v261_v7, %v260_v1 }
 0x175   :  { %v263_v12 = vsel %vm73_vm0, %v249_v8, 0.0 }
 0x176   :  { %v264_v13 = vadd.f32 %v263_v12, %v262_v11 }
 0x178   :  { %v265_v14 = vmul.f32 %v823_v3, %v264_v13  ;;  %v266_v15 = vmul.f32 %v827_v5, %v264_v13  ;;  %v267_v16 = vmul.f32 %v825_v4, %v264_v13  ;;  %v268_v19 = vmul.f32 %v829_v6, %v264_v13  ;;  %v689_v6 = vld [vmem:[%s990_s5 + $0x8] sm:$0xff]  }
 0x179   :  { %v269_v20 = vmul.f32 %v831_v9, %v264_v13  ;;  %v270_v21 = vmul.f32 %v833_v10, %v264_v13  ;;  %v271_v3 = vmul.f32 %v841_v17, %v264_v13  ;;  %v272_v5 = vmul.f32 %v843_v18, %v264_v13  ;;  %669 = vmatprep.subr.bf16.mxu1 %v689_v6  ;;  %v690_v9 = vld [vmem:[%s990_s5] sm:$0xff]  }
 0x17a   :  { %v273_v22 = vpack.c.bf16 %v266_v15, %v265_v14  ;;  %v274_v23 = vpack.c.bf16 %v268_v19, %v267_v16  ;;  %670 = vmatpush3.bf16.msra.mxu1 %v689_v6  ;;  %v612_v17 = vld [vmem:[%s989_s4] ss:$0 sm:$0xff] }
 0x17b   :  { %v275_v24 = vpack.c.bf16 %v270_v21, %v269_v20  ;;  %v276_v4 = vpack.c.bf16 %v272_v5, %v271_v3  ;;  %671 = vmatprep.subr.bf16.mxu1 %v690_v9 }
 0x17c   :  { %661 = vmatprep.mubr.msk.bf16.mxu0 %vm73_vm0, %v273_v22 }
 0x17d   :  { %662 = vmatmul.mubr.msk.bf16.vlgmr.msra.gmra.mxu0 %vm73_vm0, %v274_v23 }
 0x17e   :  { %665 = vmatprep.mubr.msk.bf16.mxu0 %vm73_vm0, %v275_v24  ;;  %672 = vmatpush3.bf16.msra.mxu1 %v690_v9 }
 0x185   :  { %666 = vmatmul.mubr.msk.bf16.gmra.mxu0 %vm73_vm0, %v276_v4 }
 0x23d   :  { %v663_v10 = vpop.f32.mrf.mxu0 }
 0x23e   :  { %v355_v28 = vadd.f32 %v663_v10, %v612_v17 }
 0x23f   :  { %v346_v25 = vpop.f32.mrf.mxu0 }
 0x240   :  { %v347_v26 = vadd.f32 %v612_v17, %v346_v25  ;;  %v379_v36 = vmax.f32 %v355_v28, 0.0 }
 0x241   :  { %v664_v18 = vpop.f32.mrf.mxu0 }
 0x242   :  { %v358_v27 = vadd.f32 %v664_v18, %v612_v17  ;;  %v377_v34 = vmax.f32 %v347_v26, 0.0 }
 0x243   :  { %v349_v29 = vpop.f32.mrf.mxu0 }
 0x244   :  { %v350_v31 = vadd.f32 %v612_v17, %v349_v29  ;;  %v380_v32 = vmax.f32 %v358_v27, 0.0 }
 0x245   :  { %v667_v33 = vpop.f32.mrf.mxu0 }
 0x246   :  { %v378_v35 = vmax.f32 %v350_v31, 0.0  ;;  %v386_v39 = vpack.c.bf16 %v380_v32, %v379_v36  ;;  %v371_v43 = vadd.f32 %v667_v33, %v612_v17 }
 0x247   :  { %v362_v37 = vpop.f32.mrf.mxu0 }
 0x248   :  { %v385_v38 = vpack.c.bf16 %v378_v35, %v377_v34  ;;  %v363_v41 = vadd.f32 %v612_v17, %v362_v37  ;;  %v383_v49 = vmax.f32 %v371_v43, 0.0 }
 0x249   :  { %v668_v40 = vpop.f32.mrf.mxu0 }
 0x24a   :  { %v374_v42 = vadd.f32 %v668_v40, %v612_v17  ;;  %673 = vmatprep.mubr.msk.bf16.mxu1 %vm73_vm0, %v385_v38  ;;  %v381_v47 = vmax.f32 %v363_v41, 0.0 }
 0x24b   :  { %v365_v44 = vpop.f32.mrf.mxu0  ;;  %674 = vmatmul.mubr.msk.bf16.vlgmr.msra.gmra.mxu1 %vm73_vm0, %v386_v39 }
 0x24c   :  { %v366_v45 = vadd.f32 %v612_v17, %v365_v44  ;;  %v384_v46 = vmax.f32 %v374_v42, 0.0 }
 0x24e   :  { %v382_v48 = vmax.f32 %v366_v45, 0.0  ;;  %v388_v30 = vpack.c.bf16 %v384_v46, %v383_v49 }
 0x250   :  { %v387_v50 = vpack.c.bf16 %v382_v48, %v381_v47 }
 0x252   :  { %677 = vmatprep.mubr.msk.bf16.mxu1 %vm73_vm0, %v387_v50 }
 0x253   :  { %678 = vmatmul.mubr.msk.bf16.gmra.mxu1 %vm73_vm0, %v388_v30 }
 0x30b   :  { %v675_v52 = vpop.f32.mrf.mxu1 }
 0x30c   :  { %v467_v53 = vadd.f32 %v675_v52, %v619_v51 }
 0x30d   :  { %v458_v54 = vpop.f32.mrf.mxu1 }
 0x30e   :  { %v459_v55 = vadd.f32 %v619_v51, %v458_v54  ;;  %v495_v56 = vsel %vm164_vm9, %v467_v53, -inf }
 0x30f   :  { %496 = vmax.xlane.f32.xlu0 %v495_v56  ;;  %v676_v57 = vpop.f32.mrf.mxu1 }
 0x310   :  { %v470_v59 = vadd.f32 %v676_v57, %v619_v51  ;;  %v489_v61 = vsel %vm164_vm9, %v459_v55, -inf }
 0x311   :  { %v461_v58 = vpop.f32.mrf.mxu1 }
 0x312   :  { %v462_v60 = vadd.f32 %v619_v51, %v461_v58  ;;  %v498_v2 = vsel %vm164_vm9, %v470_v59, -inf }
 0x313   :  { %v679_v62 = vpop.f32.mrf.mxu1  ;;  %490 = vmax.xlane.f32.xlu0 %v489_v61 }
 0x314   :  { %v492_v63 = vsel %vm164_vm9, %v462_v60, -inf  ;;  %v483_v11 = vadd.f32 %v679_v62, %v619_v51 }
 0x315   :  { %v474_v0 = vpop.f32.mrf.mxu1  ;;  %493 = vmax.xlane.f32.xlu1 %v492_v63 }
 0x316   :  { %v475_v1 = vadd.f32 %v619_v51, %v474_v0  ;;  %v507_v16 = vsel %vm164_vm9, %v483_v11, -inf }
 0x317   :  { %v680_v7 = vpop.f32.mrf.mxu1  ;;  %499 = vmax.xlane.f32.xlu0 %v498_v2 }
 0x318   :  { %v501_v13 = vsel %vm164_vm9, %v475_v1, -inf  ;;  %v486_v14 = vadd.f32 %v680_v7, %v619_v51 }
 0x319   :  { %v477_v8 = vpop.f32.mrf.mxu1 }
 0x31a   :  { %v478_v12 = vadd.f32 %v619_v51, %v477_v8  ;;  %v510_v19 = vsel %vm164_vm9, %v486_v14, -inf }
 0x31b   :  { %502 = vmax.xlane.f32.xlu0 %v501_v13 }
 0x31c   :  { %v504_v15 = vsel %vm164_vm9, %v478_v12, -inf }
 0x31d   :  { %505 = vmax.xlane.f32.xlu1 %v504_v15 }
 0x31f   :  { %508 = vmax.xlane.f32.xlu0 %v507_v16 }
 0x321   :  { %511 = vmax.xlane.f32.xlu1 %v510_v19 }
 0x398   :  { %v497_v20 = vpop.xlane.xlu0 %496 }
 0x399   :  { %v934_v21 = vsub.f32 %v467_v53, %v497_v20 }
 0x39b   :  { %v525_v22 = vmul.f32 1.442695, %v934_v21 }
 0x39c   :  { %v491_v23 = vpop.xlane.xlu0 %490 }
 0x39d   :  { %695 = vpow2.f32 %v525_v22  ;;  %v937_v24 = vsub.f32 %v459_v55, %v491_v23 }
 0x39e   :  { %v494_v3 = vpop.xlane.xlu1 %493 }
 0x39f   :  { %v521_v5 = vmul.f32 1.442695, %v937_v24  ;;  %v940_v4 = vsub.f32 %v462_v60, %v494_v3 }
 0x3a0   :  { %v500_v6 = vpop.xlane.xlu0 %499 }
 0x3a1   :  { %697 = vpow2.f32 %v521_v5  ;;  %v942_v9 = vsub.f32 %v470_v59, %v500_v6  ;;  %v523_v10 = vmul.f32 1.442695, %v940_v4 }
 0x3a3   :  { %v527_v25 = vmul.f32 1.442695, %v942_v9 }
 0x3a4   :  { %v503_v17 = vpop.xlane.xlu0 %502 }
 0x3a5   :  { %699 = vpow2.f32 %v527_v25  ;;  %v946_v18 = vsub.f32 %v475_v1, %v503_v17 }
 0x3a6   :  { %v506_v26 = vpop.xlane.xlu1 %505  ;;  %701 = vpow2.f32 %v523_v10 }
 0x3a7   :  { %v529_v27 = vmul.f32 1.442695, %v946_v18  ;;  %v949_v28 = vsub.f32 %v478_v12, %v506_v26 }
 0x3a8   :  { %v509_v29 = vpop.xlane.xlu0 %508 }
 0x3a9   :  { %703 = vpow2.f32 %v529_v27  ;;  %v531_v31 = vmul.f32 1.442695, %v949_v28  ;;  %v952_v32 = vsub.f32 %v483_v11, %v509_v29 }
 0x3aa   :  { %v696_v33 = vpop.eup %695  ;;  %v512_v34 = vpop.xlane.xlu1 %511 }
 0x3ab   :  { %705 = vpow2.f32 %v531_v31  ;;  %v533_v35 = vmul.f32 1.442695, %v952_v32  ;;  %v955_v36 = vsub.f32 %v486_v14, %v512_v34  ;;  %v543_v37 = vsel %vm164_vm9, %v696_v33, 0.0 }
 0x3ac   :  { %544 = vadd.xlane.f32.xlu0 %v543_v37 }
 0x3ad   :  { %707 = vpow2.f32 %v533_v35  ;;  %v535_v38 = vmul.f32 1.442695, %v955_v36 }
 0x3ae   :  { %v698_v39 = vpop.eup %697 }
 0x3af   :  { %709 = vpow2.f32 %v535_v38  ;;  %v537_v40 = vsel %vm164_vm9, %v698_v39, 0.0 }
 0x3b0   :  { %538 = vadd.xlane.f32.xlu0 %v537_v40 }
 0x3b2   :  { %v700_v41 = vpop.eup %699 }
 0x3b3   :  { %v546_v42 = vsel %vm164_vm9, %v700_v41, 0.0  ;;  %v702_v43 = vpop.eup %701 }
 0x3b4   :  { %547 = vadd.xlane.f32.xlu1 %v546_v42  ;;  %v540_v45 = vsel %vm164_vm9, %v702_v43, 0.0 }
 0x3b6   :  { %v704_v44 = vpop.eup %703 }
 0x3b7   :  { %v549_v46 = vsel %vm164_vm9, %v704_v44, 0.0 }
 0x3b8   :  { %v706_v47 = vpop.eup %705  ;;  %541 = vadd.xlane.f32.xlu1 %v540_v45  ;;  %550 = vadd.xlane.f32.xlu0 %v549_v46 }
 0x3b9   :  { %v552_v49 = vsel %vm164_vm9, %v706_v47, 0.0 }
 0x3ba   :  { %v708_v48 = vpop.eup %707 }
 0x3bb   :  { %v555_v50 = vsel %vm164_vm9, %v708_v48, 0.0 }
 0x3bc   :  { %v710_v30 = vpop.eup %709  ;;  %553 = vadd.xlane.f32.xlu1 %v552_v49  ;;  %556 = vadd.xlane.f32.xlu0 %v555_v50 }
 0x3bd   :  { %v558_v51 = vsel %vm164_vm9, %v710_v30, 0.0 }
 0x3c0   :  { %559 = vadd.xlane.f32.xlu1 %v558_v51 }
 0x435   :  { %v545_v52 = vpop.xlane.xlu0 %544 }
 0x436   :  { %711 = vlog2.f32 %v545_v52 }
 0x439   :  { %v539_v53 = vpop.xlane.xlu0 %538 }
 0x43a   :  { %713 = vlog2.f32 %v539_v53 }
 0x43d   :  { %v548_v54 = vpop.xlane.xlu1 %547 }
 0x43e   :  { %715 = vlog2.f32 %v548_v54 }
 0x441   :  { %v542_v55 = vpop.xlane.xlu1 %541  ;;  %v551_v56 = vpop.xlane.xlu0 %550 }
 0x442   :  { %717 = vlog2.f32 %v542_v55 }
 0x443   :  { %v712_v57 = vpop.eup %711  ;;  %719 = vlog2.f32 %v551_v56 }
 0x444   :  { %v566_v58 = vmul.f32 0.6931472, %v712_v57 }
 0x445   :  { %v554_v59 = vpop.xlane.xlu1 %553  ;;  %v557_v60 = vpop.xlane.xlu0 %556 }
 0x446   :  { %v579_v61 = vsub.f32 %v934_v21, %v566_v58  ;;  %721 = vlog2.f32 %v554_v59 }
 0x447   :  { %v714_v62 = vpop.eup %713  ;;  %723 = vlog2.f32 %v557_v60 }
 0x448   :  { %587 = vst.msk [vmem:[#allocation5 + $0x10] sm:$0xff] %vm164_vm9, %v579_v61  ;;  %v562_v63 = vmul.f32 0.6931472, %v714_v62 }
 0x449   :  { %v560_v0 = vpop.xlane.xlu1 %559 }
 0x44a   :  { %v577_v1 = vsub.f32 %v937_v24, %v562_v63  ;;  %725 = vlog2.f32 %v560_v0 }
 0x44b   :  { %v716_v2 = vpop.eup %715 }
 0x44c   :  { %585 = vst.msk [vmem:[#allocation5] sm:$0xff] %vm164_vm9, %v577_v1  ;;  %v568_v7 = vmul.f32 0.6931472, %v716_v2 }
 0x44e   :  { %v580_v8 = vsub.f32 %v942_v9, %v568_v7 }
 0x44f   :  { %v718_v11 = vpop.eup %717 }
 0x450   :  { %v720_v12 = vpop.eup %719  ;;  %588 = vst.msk [vmem:[#allocation5 + $0x18] sm:$0xff] %vm164_vm9, %v580_v8  ;;  %v564_v13 = vmul.f32 0.6931472, %v718_v11 }
 0x451   :  { %v570_v14 = vmul.f32 0.6931472, %v720_v12 }
 0x452   :  { %v578_v15 = vsub.f32 %v940_v4, %v564_v13 }
 0x453   :  { %v722_v16 = vpop.eup %721  ;;  %v581_v19 = vsub.f32 %v946_v18, %v570_v14 }
 0x454   :  { %v724_v20 = vpop.eup %723  ;;  %586 = vst.msk [vmem:[#allocation5 + $0x8] sm:$0xff] %vm164_vm9, %v578_v15  ;;  %v572_v21 = vmul.f32 0.6931472, %v722_v16 }
 0x455   :  { %589 = vst.msk [vmem:[#allocation5 + $0x20] sm:$0xff] %vm164_vm9, %v581_v19  ;;  %v574_v22 = vmul.f32 0.6931472, %v724_v20 }
 0x456   :  { %v582_v23 = vsub.f32 %v949_v28, %v572_v21 }
 0x457   :  { %v726_v24 = vpop.eup %725  ;;  %v583_v3 = vsub.f32 %v952_v32, %v574_v22 }
 0x458   :  { %590 = vst.msk [vmem:[#allocation5 + $0x28] sm:$0xff] %vm164_vm9, %v582_v23  ;;  %v576_v5 = vmul.f32 0.6931472, %v726_v24 }
 0x459   :  { %591 = vst.msk [vmem:[#allocation5 + $0x30] sm:$0xff] %vm164_vm9, %v583_v3 }
 0x45a   :  { %v584_v4 = vsub.f32 %v955_v36, %v576_v5 }
 0x45c   :  { %592 = vst.msk [vmem:[#allocation5 + $0x38] sm:$0xff] %vm164_vm9, %v584_v4 }
 0x45d   :  { %758 = shalt.err (!%p755_p9)
}
 0x45e   :  { %s775_s20 = smov 128   ;;  %s776_s21 = smov 8  }
 0x45f   :  { %604 = dma.vmem_to_hbm [thread:$0]  %s599_s18, 1024, %s992_s7, [#allocation4], %s775_s20, %s775_s20, %s776_s21  }
 0x460   :  { %769 = dma.done.wait [#allocation4], 1024  }
 0x461   :  { %770 = vsyncadd [#allocation4], 4294966272 }
 0x462   :  { %608 = vsyncpa [#allocation3], 1 }
 0x463   :  { %609 = vsyncpa [#allocation4], 1 }

</bundles_post_ra>
